<compile_context>
chip_gen: v7x
topology: tpu7x:2x2x1
jax: 0.10.0
libtpu: 0.0.40
codegen_flags: <defaults>
</compile_context>

<pallas_src>
import numpy as np
import jax
import jax.numpy as jnp
from jax.experimental import pallas as pl
from jax.experimental.pallas import tpu as pltpu

# Forward-consistent small shapes: W >= 64 (conv kernel) and strided conv
# output >= 8 (max-pool window).
B, CIN, H, W = 16, 2, 4, 128
COUT, KW, STRIDE = 16, 64, 2
WOUT = (W - KW) // STRIDE + 1          # 33 conv output positions
POOL = 8
PWIN = WOUT // POOL                    # 4 pooled positions (maxpool drops tail)
GROUPS_PER_B = H * PWIN                # 16 pool windows per batch element
CK = CIN * KW                          # 128 features per patch

TILE_B = 8                             # batch elements per grid step
TILE_GROUPS = TILE_B * GROUPS_PER_B    # 128 pool windows per tile
TILE_ROWS = TILE_GROUPS * POOL         # 1024 im2col rows per tile
assert B % TILE_B == 0
N_TILES = B // TILE_B


def eegnet_kernel(p_ref, wc_ref, par_ref, fcb_ref, o_ref):
    # Conv2d(kernel=(1,64), stride=(1,2)) as one im2col GEMM on the MXU.
    # bf16 inputs, f32 accumulation.
    conv = jnp.dot(p_ref[...], wc_ref[...], preferred_element_type=jnp.float32)
    par = par_ref[...]                                   # (2, COUT) packed params
    conv = jnp.maximum(conv + par[0:1, :], 0.0)          # + conv bias, ReLU

    # MaxPool2d((1,8)): rows are pool-major within the tile, so this is a
    # layout-free leading-dim reshape + elementwise max (no XLU reduce).
    maxed = jnp.max(conv.reshape(POOL, TILE_GROUPS, COUT), axis=0)

    # AdaptiveAvgPool2d((1,1)) + Linear(16->1); the 1/GROUPS_PER_B scale is
    # folded into the fc weight host-side.
    summed = jnp.sum(maxed.reshape(TILE_B, GROUPS_PER_B, COUT), axis=1)
    out = jnp.sum(summed * par[1:2, :], axis=1, keepdims=True)      # (TILE_B, 1)
    o_ref[...] = out + fcb_ref[0, 0]                                # + fc bias


def eegnet_forward(x, conv_w, conv_b, fc_w, fc_b):
    # ---- host-side glue: im2col patch extraction (pure data movement) ----
    # Row order is (tile, pool, b_in_tile, h, pwin) so each grid step's tile is
    # internally pool-major; feature order is (cin, kw) to match the weight.
    wo = np.arange(PWIN * POOL)                                     # kept w_out
    gather_idx = jnp.asarray(wo[:, None] * STRIDE + np.arange(KW)[None, :])
    patches = x[:, :, :, gather_idx]                   # (B, Cin, H, 32, KW)
    patches = patches.reshape(N_TILES, TILE_B, CIN, H, PWIN, POOL, KW)
    patches = jnp.transpose(patches, (0, 5, 1, 3, 4, 2, 6))
    patches = patches.reshape(N_TILES * TILE_ROWS, CK).astype(jnp.bfloat16)

    wc = conv_w.reshape(COUT, CK).T.astype(jnp.bfloat16)            # (CK, COUT)

    # Packed small parameters: row 0 = conv bias, row 1 = fc weight with the
    # adaptive-avg-pool 1/GROUPS_PER_B folded in.  fc bias goes to SMEM.
    fw_scaled = fc_w.reshape(COUT) / GROUPS_PER_B
    params = jnp.stack([conv_b, fw_scaled], axis=0).astype(jnp.float32)
    fcb = fc_b.reshape(1, 1).astype(jnp.float32)

    return pl.pallas_call(
        eegnet_kernel,
        out_shape=jax.ShapeDtypeStruct((B, 1), jnp.float32),
        grid=(N_TILES,),
        in_specs=[
            pl.BlockSpec((TILE_ROWS, CK), lambda i: (i, 0)),             # patches
            pl.BlockSpec((CK, COUT), lambda i: (0, 0)),                  # conv weight
            pl.BlockSpec((2, COUT), lambda i: (0, 0)),                   # packed params
            pl.BlockSpec((1, 1), lambda i: (0, 0),
                         memory_space=pltpu.MemorySpace.SMEM),           # fc bias
        ],
        out_specs=pl.BlockSpec((TILE_B, 1), lambda i: (i, 0)),
        compiler_params=pltpu.CompilerParams(
            dimension_semantics=("parallel",),
            vmem_limit_bytes=32 * 1024 * 1024,
        ),
    )(patches, wc, params, fcb)


def eegnet_reference(x, conv_w, conv_b, fc_w, fc_b):
    # Pure-JAX reference matching the PyTorch forward exactly (f32 throughout).
    y = jax.lax.conv_general_dilated(
        x, conv_w, window_strides=(1, STRIDE), padding="VALID",
        dimension_numbers=("NCHW", "OIHW", "NCHW"))
    y = y + conv_b[None, :, None, None]
    y = jnp.maximum(y, 0.0)
    y = jax.lax.reduce_window(y, -jnp.inf, jax.lax.max,
                              (1, 1, 1, POOL), (1, 1, 1, POOL), "VALID")
    y = jnp.mean(y, axis=(2, 3))                      # AdaptiveAvgPool2d((1,1))
    return y @ fc_w.T + fc_b


if __name__ == "__main__":
    key = jax.random.PRNGKey(0)
    k1, k2, k3, k4, k5 = jax.random.split(key, 5)
    x = jax.random.normal(k1, (B, CIN, H, W), jnp.float32)
    conv_w = jax.random.normal(k2, (COUT, CIN, 1, KW), jnp.float32) * 0.05
    conv_b = jax.random.normal(k3, (COUT,), jnp.float32) * 0.05
    fc_w = jax.random.normal(k4, (1, COUT), jnp.float32) * 0.1
    fc_b = jax.random.normal(k5, (1,), jnp.float32) * 0.1

    out = jax.jit(eegnet_forward)(x, conv_w, conv_b, fc_w, fc_b)
    out = jax.block_until_ready(out)
    assert out.shape == (B, 1)

    ref = eegnet_reference(x, conv_w, conv_b, fc_w, fc_b)
    # bf16 GEMM inputs (f32 accumulation) -> loosened tolerance vs f32 reference.
    np.testing.assert_allclose(np.asarray(out), np.asarray(ref),
                               rtol=2e-2, atol=2e-2)
    print("KERNEL_OK")
</pallas_src>

<mosaic_0001>
module attributes {stable_mosaic.version = 11 : i64} {
  func.func @eegnet_kernel(%arg0: i32, %arg1: memref<1024x128xbf16, #tpu.memory_space<vmem>>, %arg2: memref<128x16xbf16, #tpu.memory_space<vmem>>, %arg3: memref<2x16xf32, #tpu.memory_space<vmem>>, %arg4: memref<1x1xf32, #tpu.memory_space<smem>>, %arg5: memref<8x1xf32, #tpu.memory_space<vmem>>) attributes {dimension_semantics = [#tpu.dimension_semantics<parallel>], iteration_bounds = array<i64: 2>, scalar_prefetch = 0 : i64, scratch_operands = 0 : i64, tpu.core_type = #tpu.core_type<tc>, window_params = [{transform_indices = @transform_0, window_bounds = array<i64: 1024, 128>}, {pipeline_mode = #tpu.pipeline_mode<synchronous>, transform_indices = @transform_1, window_bounds = array<i64: 128, 16>}, {pipeline_mode = #tpu.pipeline_mode<synchronous>, transform_indices = @transform_2, window_bounds = array<i64: 2, 16>}, {transform_indices = @transform_3, window_bounds = array<i64: 1, 1>}, {transform_indices = @transform_4, window_bounds = array<i64: 8, 1>}]} {
    %c0 = arith.constant 0 : index
    %c0_0 = arith.constant 0 : index
    %0 = vector.load %arg1[%c0, %c0_0] : memref<1024x128xbf16, #tpu.memory_space<vmem>>, vector<1024x128xbf16>
    %c0_1 = arith.constant 0 : index
    %c0_2 = arith.constant 0 : index
    %1 = vector.load %arg2[%c0_1, %c0_2] : memref<128x16xbf16, #tpu.memory_space<vmem>>, vector<128x16xbf16>
    %cst = arith.constant dense<0.000000e+00> : vector<1024x16xf32>
    %2 = tpu.matmul %0, %1, %cst {dimension_numbers = #tpu.dot_dimension_numbers<[1], [0], [0], [1], [0, 0, 1, 1], [], []>} : vector<1024x128xbf16>, vector<128x16xbf16>, vector<1024x16xf32> -> vector<1024x16xf32>
    %c0_3 = arith.constant 0 : index
    %c0_4 = arith.constant 0 : index
    %3 = vector.load %arg3[%c0_3, %c0_4] : memref<2x16xf32, #tpu.memory_space<vmem>>, vector<2x16xf32>
    %4 = vector.extract_strided_slice %3 {offsets = [0, 0], sizes = [1, 16], strides = [1, 1]} : vector<2x16xf32> to vector<1x16xf32>
    %5 = vector.broadcast %4 : vector<1x16xf32> to vector<1024x16xf32>
    %6 = arith.addf %2, %5 : vector<1024x16xf32>
    %cst_5 = arith.constant 0.000000e+00 : f32
    %7 = vector.broadcast %cst_5 : f32 to vector<1024x16xf32>
    %8 = arith.maximumf %6, %7 : vector<1024x16xf32>
    %9 = vector.shape_cast %8 : vector<1024x16xf32> to vector<8x128x16xf32>
    %cst_6 = arith.constant dense<0xFF800000> : vector<128x16xf32>
    %10 = vector.multi_reduction <maximumf>, %9, %cst_6 [0] : vector<8x128x16xf32> to vector<128x16xf32>
    %11 = vector.shape_cast %10 : vector<128x16xf32> to vector<8x16x16xf32>
    %cst_7 = arith.constant dense<0.000000e+00> : vector<8x16xf32>
    %12 = vector.multi_reduction <add>, %11, %cst_7 [1] : vector<8x16x16xf32> to vector<8x16xf32>
    %13 = vector.extract_strided_slice %3 {offsets = [1, 0], sizes = [1, 16], strides = [1, 1]} : vector<2x16xf32> to vector<1x16xf32>
    %14 = vector.broadcast %13 : vector<1x16xf32> to vector<8x16xf32>
    %15 = arith.mulf %12, %14 : vector<8x16xf32>
    %cst_8 = arith.constant dense<0.000000e+00> : vector<8xf32>
    %16 = vector.multi_reduction <add>, %15, %cst_8 [1] : vector<8x16xf32> to vector<8xf32>
    %17 = vector.shape_cast %16 : vector<8xf32> to vector<8x1xf32>
    %c0_9 = arith.constant 0 : index
    %c0_10 = arith.constant 0 : index
    %18 = memref.load %arg4[%c0_9, %c0_10] : memref<1x1xf32, #tpu.memory_space<smem>>
    %19 = vector.broadcast %18 : f32 to vector<8x1xf32>
    %20 = arith.addf %17, %19 : vector<8x1xf32>
    %c0_11 = arith.constant 0 : index
    %c0_12 = arith.constant 0 : index
    %21 = vector.load %arg5[%c0_11, %c0_12] : memref<8x1xf32, #tpu.memory_space<vmem>>, vector<8x1xf32>
    tpu.vector_store %arg5[%c0_11, %c0_12], %20 {strides = array<i32>} : memref<8x1xf32, #tpu.memory_space<vmem>>, vector<8x1xf32>,
    return
  }
  func.func @transform_0(%arg0: i32) -> (i32, i32) {
    %c0_i32 = arith.constant 0 : i32
    %c0_i32_0 = arith.constant 0 : i32
    return %arg0, %c0_i32 : i32, i32
  }
  func.func @transform_1(%arg0: i32) -> (i32, i32) {
    %c0_i32 = arith.constant 0 : i32
    %c0_i32_0 = arith.constant 0 : i32
    %c0_i32_1 = arith.constant 0 : i32
    return %c0_i32, %c0_i32_0 : i32, i32
  }
  func.func @transform_2(%arg0: i32) -> (i32, i32) {
    %c0_i32 = arith.constant 0 : i32
    %c0_i32_0 = arith.constant 0 : i32
    %c0_i32_1 = arith.constant 0 : i32
    return %c0_i32, %c0_i32_0 : i32, i32
  }
  func.func @transform_3(%arg0: i32) -> (i32, i32) {
    %c0_i32 = arith.constant 0 : i32
    %c0_i32_0 = arith.constant 0 : i32
    %c0_i32_1 = arith.constant 0 : i32
    return %c0_i32, %c0_i32_0 : i32, i32
  }
  func.func @transform_4(%arg0: i32) -> (i32, i32) {
    %c0_i32 = arith.constant 0 : i32
    %c0_i32_0 = arith.constant 0 : i32
    return %arg0, %c0_i32 : i32, i32
  }
}

</mosaic_0001>

<bundles_post_ra>
// kernel: eegnet_forward.1
= control target key start
LH: loop header
LB: loop body
LE: loop exit
PB: predicated region body
PF: predicated region fallthrough
CT: control target
= control target key end

     0   :  { %s2300_s17 = smov 0   ;;  %s3138_s0 = inlined_call_operand.vmem [shape: bf16[2048,128], index: 0, kind: input, shape index: {}]   ;;  %s3139_s1 = inlined_call_operand.vmem [shape: bf16[128,16], index: 1, kind: input, shape index: {}]   ;;  %s3140_s2 = inlined_call_operand.vmem [shape: f32[2,16], index: 2, kind: input, shape index: {}]   ;;  %s3141_s3 = inlined_call_operand.<no memory space> [shape: f32[1,1], index: 3, kind: input, shape index: {}]   ;;  %s3142_s4 = inlined_call_operand.vmem [shape: f32[16,1], index: 4, kind: output, shape index: {}]  }
   0x1   :  { %9 = sst [smem:[#allocation2]] %s3141_s3 }
   0x2 LB: > { %s2306_s18 = sadd.s32 4294967295, %s2270_s17   ;;  %p1874_p0 = scmp.ge.s32.totalorder %s2270_s17, 1  ;;  %s2270_s17 = sphi %s2300_s17, %s15_s17  }
   0x3   : > { %p164_p1 = scmp.lt.s32.totalorder %s2270_s17, 3 }
   0x5   : > { %p165_p2 = pnand %p1874_p0, %p164_p1 }
   0x7   : > { %168 = sbr.rel (%p165_p2) target bundleno = 586 (0x24a), region = 36 }
   0xe   : > { %v2192_v0 = vld [vmem:[%s3139_s1] sm:$0xff]   ;;  %s1875_s3 = sshll.u32 %s2306_s18, 7  ;;  %v2193_v1 = vld [vmem:[%s3139_s1 + $0x8] sm:$0xff]   ;;  %v2194_v2 = vld [vmem:[%s3139_s1 + $0x10] sm:$0xff]   ;;  %vm1454_vm0 = vcmask 130048   ;;  %vm1788_vm1 = vcmask 1041409  }
   0xf   : > { %p190_p3 = scmp.lt.s32.totalorder %s1875_s3, 255  ;;  %2024 = vmatprep.subr.bf16.mxu0 %v2192_v0  ;;  %2168 = vmatprep.subr.bf16.mxu1 %v2192_v0  ;;  %v2195_v3 = vld [vmem:[%s3139_s1 + $0x18] sm:$0xff]   ;;  %v2196_v6 = vld [vmem:[%s3139_s1 + $0x20] sm:$0xff]   ;;  %v2197_v7 = vld [vmem:[%s3139_s1 + $0x28] sm:$0xff]   ;;  %vm1791_vm2 = vcmask 1042434   ;;  %vm1794_vm3 = vcmask 1043459  }
  0x10   : > { %2025 = vmatpush3.bf16.msra.mxu0 %v2192_v0  ;;  %2176 = vmatpush3.bf16.msra.mxu1 %v2192_v0  ;;  %v2198_v8 = vld [vmem:[%s3139_s1 + $0x30] sm:$0xff]   ;;  %v2199_v9 = vld [vmem:[%s3139_s1 + $0x38] sm:$0xff]   ;;  %vm1797_vm4 = vcmask 1044484   ;;  %vm1800_vm5 = vcmask 1045509   ;;  %vm1803_vm6 = vcmask 1046534   ;;  %vm1806_vm7 = vcmask 1047559  }
  0x11   : > { %s3210_s3 = smov (!%p190_p3, %s1875_s3), 255  ;;  %2026 = vmatprep.subr.bf16.mxu0 %v2193_v1  ;;  %2169 = vmatprep.subr.bf16.mxu1 %v2193_v1  ;;  %p195_p4 = scmp.lt.s32.totalorder %s2306_s18, 1  ;;  %vm1815_vm8 = vcmask 7168  }
  0x12   : > { %s1876_s25 = sshll.u32 %s3210_s3, 2  ;;  %s1812_s15 = sld [smem:[#allocation2]] }
  0x13   : > { %s2323_s28 = scalar_lea.vmem %s3138_s0, %s1876_s25  ;;  %s3212_s18 = smov (!%p195_p4, %s2306_s18), 1 }
  0x14   : > { %2027 = vmatpush3.bf16.msra.mxu0 %v2193_v1  ;;  %2177 = vmatpush3.bf16.msra.mxu1 %v2193_v1  ;;  %v2200_v4 = vld [vmem:[%s2323_s28] sm:$0xff]   ;;  %v2201_v10 = vld [vmem:[%s2323_s28 + $0x8] sm:$0xff]   ;;  %v2204_v12 = vld [vmem:[%s2323_s28 + $0x10] sm:$0xff]   ;;  %s1877_s16 = sshll.u32 %s3212_s18, 3 }
  0x15   : > { %2028 = vmatprep.subr.bf16.mxu0 %v2194_v2  ;;  %2170 = vmatprep.subr.bf16.mxu1 %v2194_v2  ;;  %v2202_v5 = vld [vmem:[%s2323_s28 + $0x100] sm:$0xff]   ;;  %v2203_v11 = vld [vmem:[%s2323_s28 + $0x108] sm:$0xff]   ;;  %v2206_v13 = vld [vmem:[%s2323_s28 + $0x110] sm:$0xff]   ;;  %s198_s3 = scalar_lea.vmem %s3142_s4, %s1877_s16 }
  0x16   : > { %2040 = vmatprep.mubr.bf16.mxu0 %v2200_v4  ;;  %2104 = vmatprep.mubr.bf16.mxu1 %v2202_v5  ;;  %v2205_v14 = vld [vmem:[%s2323_s28 + $0x18] sm:$0xff]   ;;  %v2208_v16 = vld [vmem:[%s2323_s28 + $0x20] sm:$0xff]   ;;  %v2209_v18 = vld [vmem:[%s2323_s28 + $0x28] sm:$0xff]  }
  0x17   : > { %v2207_v15 = vld [vmem:[%s2323_s28 + $0x118] sm:$0xff]   ;;  %v2210_v17 = vld [vmem:[%s2323_s28 + $0x120] sm:$0xff]   ;;  %v2211_v19 = vld [vmem:[%s2323_s28 + $0x128] sm:$0xff]  }
  0x18   : > { %2029 = vmatpush3.bf16.msra.mxu0 %v2194_v2  ;;  %2178 = vmatpush3.bf16.msra.mxu1 %v2194_v2  ;;  %v2212_v20 = vld [vmem:[%s2323_s28 + $0x30] sm:$0xff]   ;;  %v2213_v22 = vld [vmem:[%s2323_s28 + $0x38] sm:$0xff]   ;;  %v2216_v24 = vld [vmem:[%s2323_s28 + $0x40] sm:$0xff]  }
  0x19   : > { %2030 = vmatprep.subr.bf16.mxu0 %v2195_v3  ;;  %2171 = vmatprep.subr.bf16.mxu1 %v2195_v3  ;;  %v2214_v21 = vld [vmem:[%s2323_s28 + $0x130] sm:$0xff]   ;;  %v2215_v23 = vld [vmem:[%s2323_s28 + $0x138] sm:$0xff]   ;;  %v2218_v25 = vld [vmem:[%s2323_s28 + $0x140] sm:$0xff]  }
  0x1a   : > { %v2217_v26 = vld [vmem:[%s2323_s28 + $0x48] sm:$0xff]   ;;  %v2220_v28 = vld [vmem:[%s2323_s28 + $0x50] sm:$0xff]   ;;  %v2221_v30 = vld [vmem:[%s2323_s28 + $0x58] sm:$0xff]  }
  0x1b   : > { %v2219_v27 = vld [vmem:[%s2323_s28 + $0x148] sm:$0xff]   ;;  %v2222_v29 = vld [vmem:[%s2323_s28 + $0x150] sm:$0xff]   ;;  %v2223_v31 = vld [vmem:[%s2323_s28 + $0x158] sm:$0xff]  }
  0x1c   : > { %2031 = vmatpush3.bf16.msra.mxu0 %v2195_v3  ;;  %2179 = vmatpush3.bf16.msra.mxu1 %v2195_v3  ;;  %v2224_v32 = vld [vmem:[%s2323_s28 + $0x60] sm:$0xff]   ;;  %v2225_v34 = vld [vmem:[%s2323_s28 + $0x68] sm:$0xff]   ;;  %v2228_v36 = vld [vmem:[%s2323_s28 + $0x70] sm:$0xff]  }
  0x1d   : > { %2032 = vmatprep.subr.bf16.mxu0 %v2196_v6  ;;  %2172 = vmatprep.subr.bf16.mxu1 %v2196_v6  ;;  %v2226_v33 = vld [vmem:[%s2323_s28 + $0x160] sm:$0xff]   ;;  %v2227_v35 = vld [vmem:[%s2323_s28 + $0x168] sm:$0xff]   ;;  %v2230_v37 = vld [vmem:[%s2323_s28 + $0x170] sm:$0xff]  }
  0x1e   : > { %v2229_v38 = vld [vmem:[%s2323_s28 + $0x78] sm:$0xff]   ;;  %v2232_v40 = vld [vmem:[%s2323_s28 + $0x80] sm:$0xff]   ;;  %v2233_v42 = vld [vmem:[%s2323_s28 + $0x88] sm:$0xff]  }
  0x1f   : > { %v2231_v39 = vld [vmem:[%s2323_s28 + $0x178] sm:$0xff]   ;;  %v2234_v41 = vld [vmem:[%s2323_s28 + $0x180] sm:$0xff]   ;;  %v2235_v43 = vld [vmem:[%s2323_s28 + $0x188] sm:$0xff]  }
  0x20   : > { %2033 = vmatpush3.bf16.msra.mxu0 %v2196_v6  ;;  %2180 = vmatpush3.bf16.msra.mxu1 %v2196_v6  ;;  %v2236_v44 = vld [vmem:[%s2323_s28 + $0x90] sm:$0xff]   ;;  %v2237_v46 = vld [vmem:[%s2323_s28 + $0x98] sm:$0xff]   ;;  %v2240_v48 = vld [vmem:[%s2323_s28 + $0xa0] sm:$0xff]  }
  0x21   : > { %2034 = vmatprep.subr.bf16.mxu0 %v2197_v7  ;;  %2173 = vmatprep.subr.bf16.mxu1 %v2197_v7  ;;  %v2238_v45 = vld [vmem:[%s2323_s28 + $0x190] sm:$0xff]   ;;  %v2239_v47 = vld [vmem:[%s2323_s28 + $0x198] sm:$0xff]   ;;  %v2242_v49 = vld [vmem:[%s2323_s28 + $0x1a0] sm:$0xff]  }
  0x22   : > { %v2241_v50 = vld [vmem:[%s2323_s28 + $0xa8] sm:$0xff]   ;;  %v2244_v52 = vld [vmem:[%s2323_s28 + $0xb0] sm:$0xff]   ;;  %v2245_v54 = vld [vmem:[%s2323_s28 + $0xb8] sm:$0xff]  }
  0x23   : > { %v2243_v51 = vld [vmem:[%s2323_s28 + $0x1a8] sm:$0xff]   ;;  %v2246_v53 = vld [vmem:[%s2323_s28 + $0x1b0] sm:$0xff]   ;;  %v2247_v55 = vld [vmem:[%s2323_s28 + $0x1b8] sm:$0xff]  }
  0x24   : > { %2035 = vmatpush3.bf16.msra.mxu0 %v2197_v7  ;;  %2181 = vmatpush3.bf16.msra.mxu1 %v2197_v7  ;;  %v2248_v56 = vld [vmem:[%s2323_s28 + $0xc0] sm:$0xff]   ;;  %v2249_v58 = vld [vmem:[%s2323_s28 + $0xc8] sm:$0xff]   ;;  %v2252_v60 = vld [vmem:[%s2323_s28 + $0xd0] sm:$0xff]  }
  0x25   : > { %2036 = vmatprep.subr.bf16.mxu0 %v2198_v8  ;;  %2174 = vmatprep.subr.bf16.mxu1 %v2198_v8  ;;  %v2250_v57 = vld [vmem:[%s2323_s28 + $0x1c0] sm:$0xff]   ;;  %v2251_v59 = vld [vmem:[%s2323_s28 + $0x1c8] sm:$0xff]   ;;  %v2254_v61 = vld [vmem:[%s2323_s28 + $0x1d0] sm:$0xff]  }
  0x26   : > { %v2253_v62 = vld [vmem:[%s2323_s28 + $0xd8] sm:$0xff]   ;;  %v2256_v0 = vld [vmem:[%s2323_s28 + $0xe0] sm:$0xff]   ;;  %v2257_v2 = vld [vmem:[%s2323_s28 + $0xe8] sm:$0xff]  }
  0x27   : > { %v2255_v63 = vld [vmem:[%s2323_s28 + $0x1d8] sm:$0xff]   ;;  %v2258_v1 = vld [vmem:[%s2323_s28 + $0x1e0] sm:$0xff]   ;;  %v2259_v3 = vld [vmem:[%s2323_s28 + $0x1e8] sm:$0xff]  }
  0x28   : > { %2037 = vmatpush3.bf16.msra.mxu0 %v2198_v8  ;;  %2182 = vmatpush3.bf16.msra.mxu1 %v2198_v8  ;;  %v2260_v4 = vld [vmem:[%s2323_s28 + $0xf0] sm:$0xff]   ;;  %v2261_v6 = vld [vmem:[%s2323_s28 + $0xf8] sm:$0xff]   ;;  %v345_v8 = vlaneseq }
  0x29   : > { %2038 = vmatprep.subr.bf16.mxu0 %v2199_v9  ;;  %2175 = vmatprep.subr.bf16.mxu1 %v2199_v9  ;;  %v2262_v5 = vld [vmem:[%s2323_s28 + $0x1f0] sm:$0xff]   ;;  %v2263_v7 = vld [vmem:[%s2323_s28 + $0x1f8] sm:$0xff]  }
  0x2c   : > { %2039 = vmatpush3.bf16.msra.mxu0 %v2199_v9  ;;  %2183 = vmatpush3.bf16.msra.mxu1 %v2199_v9 }
  0x2f   : > { %2041 = vmatmul.mubr.bf16.vlgmr.msra.gmra.mrb[0].mxu0 %v2201_v10  ;;  %2105 = vmatmul.mubr.bf16.vlgmr.msra.gmra.mrb[0].mxu1 %v2203_v11 }
  0x30   : > { %2044 = vmatprep.mubr.bf16.mxu0 %v2204_v12  ;;  %2108 = vmatprep.mubr.bf16.mxu1 %v2206_v13  ;;  %v346_v13 = vshrl.u32 %v345_v8, 7 }
  0x37   : > { %2045 = vmatmul.mubr.bf16.gmra.mrb[4].mxu0 %v2205_v14  ;;  %2109 = vmatmul.mubr.bf16.gmra.mrb[4].mxu1 %v2207_v15 }
  0x38   : > { %2048 = vmatprep.mubr.bf16.mxu0 %v2208_v16  ;;  %2112 = vmatprep.mubr.bf16.mxu1 %v2210_v17 }
  0x3f   : > { %2049 = vmatmul.mubr.bf16.gmra.mrb[8].mxu0 %v2209_v18  ;;  %2113 = vmatmul.mubr.bf16.gmra.mrb[8].mxu1 %v2211_v19  ;;  %v347_v18 = vsub.s32 0, %v346_v13  ;;  %v344_v19 = vld [vmem:[%s3140_s2] sm:$0x3] }
  0x40   : > { %2052 = vmatprep.mubr.bf16.mxu0 %v2212_v20  ;;  %2116 = vmatprep.mubr.bf16.mxu1 %v2214_v21 }
  0x47   : > { %2053 = vmatmul.mubr.bf16.gmra.mrb[12].mxu0 %v2213_v22  ;;  %2117 = vmatmul.mubr.bf16.gmra.mrb[12].mxu1 %v2215_v23 }
  0x48   : > { %2056 = vmatprep.mubr.bf16.mxu0 %v2216_v24  ;;  %2120 = vmatprep.mubr.bf16.mxu1 %v2218_v25  ;;  %v2407_v24 = vrot.slane %v344_v19, %v347_v18 }
  0x4f   : > { %2057 = vmatmul.mubr.bf16.gmra.mrb[16].mxu0 %v2217_v26  ;;  %2121 = vmatmul.mubr.bf16.gmra.mrb[16].mxu1 %v2219_v27 }
  0x50   : > { %2060 = vmatprep.mubr.bf16.mxu0 %v2220_v28  ;;  %2124 = vmatprep.mubr.bf16.mxu1 %v2222_v29 }
  0x57   : > { %2061 = vmatmul.mubr.bf16.gmra.mrb[20].mxu0 %v2221_v30  ;;  %2125 = vmatmul.mubr.bf16.gmra.mrb[20].mxu1 %v2223_v31 }
  0x58   : > { %2064 = vmatprep.mubr.bf16.mxu0 %v2224_v32  ;;  %2128 = vmatprep.mubr.bf16.mxu1 %v2226_v33 }
  0x5f   : > { %2065 = vmatmul.mubr.bf16.gmra.mrb[24].mxu0 %v2225_v34  ;;  %2129 = vmatmul.mubr.bf16.gmra.mrb[24].mxu1 %v2227_v35 }
  0x60   : > { %2068 = vmatprep.mubr.bf16.mxu0 %v2228_v36  ;;  %2132 = vmatprep.mubr.bf16.mxu1 %v2230_v37 }
  0x67   : > { %2069 = vmatmul.mubr.bf16.gmra.mrb[28].mxu0 %v2229_v38  ;;  %2133 = vmatmul.mubr.bf16.gmra.mrb[28].mxu1 %v2231_v39  ;;  %v1769_v38 = vsub.s32 1, %v346_v13 }
  0x68   : > { %2072 = vmatprep.mubr.bf16.mxu0 %v2232_v40  ;;  %2136 = vmatprep.mubr.bf16.mxu1 %v2234_v41 }
  0x6f   : > { %2073 = vmatmul.mubr.bf16.gmra.mrb[32].mxu0 %v2233_v42  ;;  %2137 = vmatmul.mubr.bf16.gmra.mrb[32].mxu1 %v2235_v43 }
  0x70   : > { %2076 = vmatprep.mubr.bf16.mxu0 %v2236_v44  ;;  %2140 = vmatprep.mubr.bf16.mxu1 %v2238_v45 }
  0x77   : > { %2077 = vmatmul.mubr.bf16.gmra.mrb[36].mxu0 %v2237_v46  ;;  %2141 = vmatmul.mubr.bf16.gmra.mrb[36].mxu1 %v2239_v47 }
  0x78   : > { %2080 = vmatprep.mubr.bf16.mxu0 %v2240_v48  ;;  %2144 = vmatprep.mubr.bf16.mxu1 %v2242_v49 }
  0x7f   : > { %2081 = vmatmul.mubr.bf16.gmra.mrb[40].mxu0 %v2241_v50  ;;  %2145 = vmatmul.mubr.bf16.gmra.mrb[40].mxu1 %v2243_v51 }
  0x80   : > { %2084 = vmatprep.mubr.bf16.mxu0 %v2244_v52  ;;  %2148 = vmatprep.mubr.bf16.mxu1 %v2246_v53  ;;  %v2418_v52 = vrot.slane %v344_v19, %v1769_v38 }
  0x82   : > { %3144 = vst [vmem:[#allocation3_spill] sm:$0xff] %v2418_v52 }
  0x87   : > { %2085 = vmatmul.mubr.bf16.gmra.mrb[44].mxu0 %v2245_v54  ;;  %2149 = vmatmul.mubr.bf16.gmra.mrb[44].mxu1 %v2247_v55 }
  0x88   : > { %2088 = vmatprep.mubr.bf16.mxu0 %v2248_v56  ;;  %2152 = vmatprep.mubr.bf16.mxu1 %v2250_v57 }
  0x8f   : > { %2089 = vmatmul.mubr.bf16.gmra.mrb[48].mxu0 %v2249_v58  ;;  %2153 = vmatmul.mubr.bf16.gmra.mrb[48].mxu1 %v2251_v59 }
  0x90   : > { %2092 = vmatprep.mubr.bf16.mxu0 %v2252_v60  ;;  %2156 = vmatprep.mubr.bf16.mxu1 %v2254_v61 }
  0x97   : > { %2093 = vmatmul.mubr.bf16.gmra.mrb[52].mxu0 %v2253_v62  ;;  %2157 = vmatmul.mubr.bf16.gmra.mrb[52].mxu1 %v2255_v63 }
  0x98   : > { %2096 = vmatprep.mubr.bf16.mxu0 %v2256_v0  ;;  %2160 = vmatprep.mubr.bf16.mxu1 %v2258_v1 }
  0x9f   : > { %2097 = vmatmul.mubr.bf16.gmra.mrb[56].mxu0 %v2257_v2  ;;  %2161 = vmatmul.mubr.bf16.gmra.mrb[56].mxu1 %v2259_v3 }
  0xa0   : > { %2100 = vmatprep.mubr.bf16.mxu0 %v2260_v4  ;;  %2164 = vmatprep.mubr.bf16.mxu1 %v2262_v5 }
  0xa7   : > { %2101 = vmatmul.mubr.bf16.gmra.mrb[60].mxu0 %v2261_v6  ;;  %2165 = vmatmul.mubr.bf16.gmra.mrb[60].mxu1 %v2263_v7 }
 0x102   : > { %v2042_v9 = vpop.f32.mrb[0].mxu0  ;;  %v2106_v10 = vpop.f32.mrb[0].mxu1 }
 0x103   : > { %v815_v11 = vpop.f32.mrb[1].mxu0  ;;  %v1071_v12 = vpop.f32.mrb[1].mxu1  ;;  %v824_v29 = vadd.f32 %v2042_v9, %v2407_v24  ;;  %v1080_v30 = vadd.f32 %v2106_v10, %v2407_v24 }
 0x104   : > { %v2043_v14 = vpop.f32.mrb[2].mxu0  ;;  %v2107_v15 = vpop.f32.mrb[2].mxu1  ;;  %v816_v31 = vadd.f32 %v815_v11, %v2407_v24  ;;  %v1072_v32 = vadd.f32 %v1071_v12, %v2407_v24 }
 0x105   : > { %v818_v16 = vpop.f32.mrb[3].mxu0  ;;  %v1074_v17 = vpop.f32.mrb[3].mxu1  ;;  %v827_v35 = vadd.f32 %v2043_v14, %v2407_v24  ;;  %v1328_v39 = vmax.f32 %v824_v29, 0.0  ;;  %v1392_v40 = vmax.f32 %v1080_v30, 0.0  ;;  %v1083_v41 = vadd.f32 %v2107_v15, %v2407_v24 }
 0x106   : > { %v1326_v44 = vmax.f32 %v816_v31, 0.0  ;;  %v819_v45 = vadd.f32 %v818_v16, %v2407_v24  ;;  %v1390_v48 = vmax.f32 %v1072_v32, 0.0  ;;  %v1075_v49 = vadd.f32 %v1074_v17, %v2407_v24 }
 0x107   : > { %v1329_v50 = vmax.f32 %v827_v35, 0.0  ;;  %v2421_v53 = vsel %vm1454_vm0, %v1328_v39, -inf  ;;  %v2424_v54 = vsel %vm1454_vm0, %v1392_v40, -inf  ;;  %v1393_v55 = vmax.f32 %v1083_v41, 0.0 }
 0x108   : > { %v2428_v57 = vsel %vm1454_vm0, %v1326_v44, -inf  ;;  %v1327_v58 = vmax.f32 %v819_v45, 0.0  ;;  %v2433_v61 = vsel %vm1454_vm0, %v1390_v48, -inf  ;;  %v1391_v62 = vmax.f32 %v1075_v49, 0.0 }
 0x109   : > { %v2442_v3 = vsel %vm1454_vm0, %v1329_v50, -inf  ;;  %v2451_v9 = vsel %vm1454_vm0, %v1393_v55, -inf }
 0x10a   : > { %v2046_v20 = vpop.f32.mrb[4].mxu0  ;;  %v2110_v21 = vpop.f32.mrb[4].mxu1  ;;  %v2460_v15 = vsel %vm1454_vm0, %v1327_v58, -inf }
 0x10b   : > { %v831_v22 = vpop.f32.mrb[5].mxu0  ;;  %v1087_v23 = vpop.f32.mrb[5].mxu1  ;;  %v840_v51 = vadd.f32 %v2046_v20, %v2407_v24  ;;  %v1096_v56 = vadd.f32 %v2110_v21, %v2407_v24  ;;  %v2468_v21 = vsel %vm1454_vm0, %v1391_v62, -inf }
 0x10c   : > { %v2047_v25 = vpop.f32.mrb[6].mxu0  ;;  %v2111_v26 = vpop.f32.mrb[6].mxu1  ;;  %v832_v59 = vadd.f32 %v831_v22, %v2407_v24  ;;  %v1088_v60 = vadd.f32 %v1087_v23, %v2407_v24  ;;  %3145 = vst [vmem:[#allocation4_spill] sm:$0xff] %v2468_v21 }
 0x10d   : > { %v834_v27 = vpop.f32.mrb[7].mxu0  ;;  %v1090_v28 = vpop.f32.mrb[7].mxu1  ;;  %v843_v63 = vadd.f32 %v2047_v25, %v2407_v24  ;;  %v1099_v0 = vadd.f32 %v2111_v26, %v2407_v24  ;;  %v1332_v4 = vmax.f32 %v840_v51, 0.0  ;;  %v1396_v10 = vmax.f32 %v1096_v56, 0.0 }
 0x10e   : > { %v835_v5 = vadd.f32 %v834_v27, %v2407_v24  ;;  %v1091_v6 = vadd.f32 %v1090_v28, %v2407_v24  ;;  %v1330_v16 = vmax.f32 %v832_v59, 0.0  ;;  %v1394_v17 = vmax.f32 %v1088_v60, 0.0 }
 0x10f   : > { %v1333_v22 = vmax.f32 %v843_v63, 0.0  ;;  %v1397_v23 = vmax.f32 %v1099_v0, 0.0  ;;  %v2472_v26 = vsel %vm1454_vm0, %v1332_v4, -inf  ;;  %v2476_v30 = vsel %vm1454_vm0, %v1396_v10, -inf }
 0x110   : > { %v1331_v27 = vmax.f32 %v835_v5, 0.0  ;;  %v1395_v28 = vmax.f32 %v1091_v6, 0.0  ;;  %3146 = vst [vmem:[#allocation5_spill] sm:$0xff] %v2476_v30  ;;  %v2483_v35 = vsel %vm1454_vm0, %v1394_v17, -inf }
 0x111   : > { %3147 = vst [vmem:[#allocation6_spill] sm:$0xff] %v2483_v35  ;;  %v2487_v38 = vsel %vm1454_vm0, %v1333_v22, -inf  ;;  %v2490_v39 = vsel %vm1454_vm0, %v1397_v23, -inf }
 0x112   : > { %v2050_v33 = vpop.f32.mrb[8].mxu0  ;;  %v2114_v34 = vpop.f32.mrb[8].mxu1  ;;  %3148 = vst [vmem:[#allocation7_spill] sm:$0xff] %v2490_v39  ;;  %v2496_v44 = vsel %vm1454_vm0, %v1331_v27, -inf  ;;  %v2499_v45 = vsel %vm1454_vm0, %v1395_v28, -inf }
 0x113   : > { %v847_v36 = vpop.f32.mrb[9].mxu0  ;;  %v1103_v37 = vpop.f32.mrb[9].mxu1  ;;  %v856_v11 = vadd.f32 %v2050_v33, %v2407_v24  ;;  %v1112_v12 = vadd.f32 %v2114_v34, %v2407_v24  ;;  %v2480_v34 = vsel %vm1454_vm0, %v1330_v16, -inf  ;;  %3149 = vst [vmem:[#allocation8_spill] sm:$0xff] %v2499_v45 }
 0x114   : > { %v2051_v42 = vpop.f32.mrb[10].mxu0  ;;  %v2115_v43 = vpop.f32.mrb[10].mxu1  ;;  %v848_v18 = vadd.f32 %v847_v36, %v2407_v24  ;;  %v1104_v25 = vadd.f32 %v1103_v37, %v2407_v24 }
 0x115   : > { %v850_v46 = vpop.f32.mrb[11].mxu0  ;;  %v1106_v47 = vpop.f32.mrb[11].mxu1  ;;  %v859_v29 = vadd.f32 %v2051_v42, %v2407_v24  ;;  %v1336_v31 = vmax.f32 %v856_v11, 0.0  ;;  %v1400_v32 = vmax.f32 %v1112_v12, 0.0  ;;  %v1115_v33 = vadd.f32 %v2115_v43, %v2407_v24 }
 0x116   : > { %v1334_v36 = vmax.f32 %v848_v18, 0.0  ;;  %v851_v37 = vadd.f32 %v850_v46, %v2407_v24  ;;  %v1398_v40 = vmax.f32 %v1104_v25, 0.0  ;;  %v1107_v41 = vadd.f32 %v1106_v47, %v2407_v24 }
 0x117   : > { %v1337_v48 = vmax.f32 %v859_v29, 0.0  ;;  %v2505_v51 = vsel %vm1454_vm0, %v1336_v31, -inf  ;;  %v2508_v47 = vsel %vm1454_vm0, %v1400_v32, -inf  ;;  %v1401_v55 = vmax.f32 %v1115_v33, 0.0 }
 0x118   : > { %3150 = vst [vmem:[#allocation9_spill] sm:$0xff] %v2508_v47  ;;  %v2514_v60 = vsel %vm1454_vm0, %v1334_v36, -inf  ;;  %v1335_v62 = vmax.f32 %v851_v37, 0.0  ;;  %v2520_v6 = vsel %vm1454_vm0, %v1398_v40, -inf  ;;  %v1399_v10 = vmax.f32 %v1107_v41, 0.0 }
 0x119   : > { %3151 = vst [vmem:[#allocation10_spill] sm:$0xff] %v2520_v6  ;;  %v2524_v16 = vsel %vm1454_vm0, %v1337_v48, -inf  ;;  %v2539_v29 = vsel %vm1454_vm0, %v1401_v55, -inf }
 0x11a   : > { %v2437_v1 = vpop.f32.mrb[12].mxu0  ;;  %v2439_v2 = vpop.f32.mrb[12].mxu1  ;;  %3152 = vst [vmem:[#allocation11_spill] sm:$0xff] %v2539_v29 }
 0x11b   : > { %v2446_v7 = vpop.f32.mrb[13].mxu0  ;;  %v2448_v8 = vpop.f32.mrb[13].mxu1  ;;  %v872_v17 = vadd.f32 %v2437_v1, %v2407_v24  ;;  %v1128_v23 = vadd.f32 %v2439_v2, %v2407_v24  ;;  %v2549_v2 = vsel %vm1454_vm0, %v1335_v62, -inf }
 0x11c   : > { %v2455_v13 = vpop.f32.mrb[14].mxu0  ;;  %v2457_v14 = vpop.f32.mrb[14].mxu1  ;;  %v864_v1 = vadd.f32 %v2446_v7, %v2407_v24  ;;  %v1120_v33 = vadd.f32 %v2448_v8, %v2407_v24  ;;  %v2566_v8 = vsel %vm1454_vm0, %v1399_v10, -inf }
 0x11d   : > { %v2463_v19 = vpop.f32.mrb[15].mxu0  ;;  %v2465_v20 = vpop.f32.mrb[15].mxu1  ;;  %v1340_v41 = vmax.f32 %v872_v17, 0.0  ;;  %3153 = vst [vmem:[#allocation12_spill] sm:$0xff] %v2566_v8 }
 0x11e   : > { %v1402_v10 = vmax.f32 %v1120_v33, 0.0 }
 0x122   : > { %v2058_v42 = vpop.f32.mrb[16].mxu0  ;;  %v2493_v43 = vpop.f32.mrb[16].mxu1 }
 0x123   : > { %v888_v46 = vadd.f32 %v2058_v42, %v2407_v24  ;;  %v879_v49 = vpop.f32.mrb[17].mxu0  ;;  %v2502_v50 = vpop.f32.mrb[17].mxu1  ;;  %v875_v42 = vadd.f32 %v2455_v13, %v2407_v24  ;;  %v1338_v13 = vmax.f32 %v864_v1, 0.0 }
 0x124   : > { %v880_v56 = vadd.f32 %v879_v49, %v2407_v24  ;;  %v2059_v58 = vpop.f32.mrb[18].mxu0  ;;  %v2511_v59 = vpop.f32.mrb[18].mxu1 }
 0x125   : > { %v1344_v63 = vmax.f32 %v888_v46, 0.0  ;;  %v891_v0 = vadd.f32 %v2059_v58, %v2407_v24  ;;  %v882_v4 = vpop.f32.mrb[19].mxu0  ;;  %v2517_v5 = vpop.f32.mrb[19].mxu1  ;;  %v1131_v58 = vadd.f32 %v2457_v14, %v2407_v24  ;;  %v1341_v1 = vmax.f32 %v875_v42, 0.0 }
 0x126   : > { %v1342_v11 = vmax.f32 %v880_v56, 0.0  ;;  %v883_v12 = vadd.f32 %v882_v4, %v2407_v24  ;;  %v1404_v56 = vmax.f32 %v1128_v23, 0.0  ;;  %v867_v4 = vadd.f32 %v2463_v19, %v2407_v24 }
 0x127   : > { %v2529_v18 = vsel %vm1454_vm0, %v1344_v63, -inf  ;;  %v1345_v22 = vmax.f32 %v891_v0, 0.0  ;;  %v1123_v23 = vadd.f32 %v2465_v20, %v2407_v24  ;;  %v1136_v42 = vadd.f32 %v2502_v50, %v2407_v24 }
 0x128   : > { %v2536_v27 = vsel %vm1454_vm0, %v1342_v11, -inf  ;;  %v1343_v28 = vmax.f32 %v883_v12, 0.0  ;;  %v1147_v48 = vadd.f32 %v2511_v59, %v2407_v24 }
 0x129   : > { %v2546_v32 = vsel %vm1454_vm0, %v1345_v22, -inf  ;;  %v1406_v29 = vmax.f32 %v1136_v42, 0.0 }
 0x12a   : > { %v2556_v37 = vsel %vm1454_vm0, %v1343_v28, -inf  ;;  %v2062_v40 = vpop.f32.mrb[20].mxu0  ;;  %v2126_v7 = vpop.f32.mrb[20].mxu1 }
 0x12b   : > { %v904_v46 = vadd.f32 %v2062_v40, %v2407_v24  ;;  %v895_v49 = vpop.f32.mrb[21].mxu0  ;;  %v2563_v55 = vpop.f32.mrb[21].mxu1  ;;  %v2582_v40 = vsel %vm1454_vm0, %v1340_v41, -inf  ;;  %v1405_v41 = vmax.f32 %v1131_v58, 0.0  ;;  %v1144_v58 = vadd.f32 %v2493_v43, %v2407_v24 }
 0x12c   : > { %v896_v62 = vadd.f32 %v895_v49, %v2407_v24  ;;  %v2063_v63 = vpop.f32.mrb[22].mxu0  ;;  %v2571_v0 = vpop.f32.mrb[22].mxu1  ;;  %v1160_v59 = vadd.f32 %v2126_v7, %v2407_v24 }
 0x12d   : > { %v1348_v11 = vmax.f32 %v904_v46, 0.0  ;;  %v907_v12 = vadd.f32 %v2063_v63, %v2407_v24  ;;  %v898_v17 = vpop.f32.mrb[23].mxu0  ;;  %v2576_v22 = vpop.f32.mrb[23].mxu1  ;;  %v2588_v46 = vsel %vm1454_vm0, %v1404_v56, -inf  ;;  %v2604_v56 = vsel %vm1454_vm0, %v1402_v10, -inf }
 0x12e   : > { %v1346_v14 = vmax.f32 %v896_v62, 0.0  ;;  %v899_v28 = vadd.f32 %v898_v17, %v2407_v24  ;;  %3154 = vst [vmem:[#allocation13_spill] sm:$0xff] %v2588_v46  ;;  %v2596_v62 = vsel %vm1454_vm0, %v1338_v13, -inf  ;;  %3155 = vst [vmem:[#allocation14_spill] sm:$0xff] %v2604_v56  ;;  %v2619_v17 = vsel %vm1454_vm0, %v1341_v1, -inf }
 0x12f   : > { %v2585_v49 = vsel %vm1454_vm0, %v1348_v11, -inf  ;;  %v1349_v19 = vmax.f32 %v907_v12, 0.0  ;;  %v1339_v12 = vmax.f32 %v867_v4, 0.0  ;;  %v2625_v50 = vsel %vm1454_vm0, %v1405_v41, -inf }
 0x130   : > { %v2593_v63 = vsel %vm1454_vm0, %v1346_v14, -inf  ;;  %v1347_v20 = vmax.f32 %v899_v28, 0.0  ;;  %3156 = vst [vmem:[#allocation15_spill] sm:$0xff] %v2625_v50  ;;  %v1139_v4 = vadd.f32 %v2517_v5, %v2407_v24  ;;  %v1408_v8 = vmax.f32 %v1144_v58, 0.0 }
 0x131   : > { %v2601_v11 = vsel %vm1454_vm0, %v1349_v19, -inf  ;;  %v1409_v5 = vmax.f32 %v1147_v48, 0.0  ;;  %v1412_v48 = vmax.f32 %v1160_v59, 0.0 }
 0x132   : > { %v2609_v14 = vsel %vm1454_vm0, %v1347_v20, -inf  ;;  %v2066_v28 = vpop.f32.mrb[24].mxu0  ;;  %v2130_v13 = vpop.f32.mrb[24].mxu1  ;;  %v1403_v20 = vmax.f32 %v1123_v23, 0.0  ;;  %v2631_v23 = vsel %vm1454_vm0, %v1339_v12, -inf  ;;  %v1407_v6 = vmax.f32 %v1139_v4, 0.0 }
 0x133   : > { %v920_v10 = vadd.f32 %v2066_v28, %v2407_v24  ;;  %v911_v19 = vpop.f32.mrb[25].mxu0  ;;  %v1167_v33 = vpop.f32.mrb[25].mxu1  ;;  %v2680_v45 = vsel %vm1454_vm0, %v1412_v48, -inf }
 0x134   : > { %v912_v36 = vadd.f32 %v911_v19, %v2407_v24  ;;  %v2067_v43 = vpop.f32.mrb[26].mxu0  ;;  %v2131_v31 = vpop.f32.mrb[26].mxu1  ;;  %3161 = vst [vmem:[#allocation20_spill] sm:$0xff] %v2680_v45  ;;  %v1168_v35 = vadd.f32 %v1167_v33, %v2407_v24 }
 0x135   : > { %v1352_v28 = vmax.f32 %v920_v10, 0.0  ;;  %v923_v25 = vadd.f32 %v2067_v43, %v2407_v24  ;;  %v914_v56 = vpop.f32.mrb[27].mxu0  ;;  %v1170_v1 = vpop.f32.mrb[27].mxu1 }
 0x136   : > { %v1350_v46 = vmax.f32 %v912_v36, 0.0  ;;  %v915_v19 = vadd.f32 %v914_v56, %v2407_v24  ;;  %v1152_v36 = vadd.f32 %v2563_v55, %v2407_v24  ;;  %v2659_v55 = vsel %vm1454_vm0, %v1408_v8, -inf }
 0x137   : > { %v2636_v41 = vsel %vm1454_vm0, %v1352_v28, -inf  ;;  %v1353_v50 = vmax.f32 %v923_v25, 0.0  ;;  %v2651_v25 = vsel %vm1454_vm0, %v1403_v20, -inf  ;;  %v1163_v28 = vadd.f32 %v2571_v0, %v2407_v24 }
 0x138   : > { %v2641_v43 = vsel %vm1454_vm0, %v1350_v46, -inf  ;;  %v1351_v12 = vmax.f32 %v915_v19, 0.0  ;;  %3157 = vst [vmem:[#allocation16_spill] sm:$0xff] %v2651_v25  ;;  %v2667_v56 = vsel %vm1454_vm0, %v1406_v29, -inf  ;;  %v1155_v8 = vadd.f32 %v2576_v22, %v2407_v24 }
 0x139   : > { %v2648_v42 = vsel %vm1454_vm0, %v1353_v50, -inf  ;;  %3158 = vst [vmem:[#allocation17_spill] sm:$0xff] %v2667_v56  ;;  %v2676_v25 = vsel %vm1454_vm0, %v1407_v6, -inf  ;;  %v1410_v50 = vmax.f32 %v1152_v36, 0.0 }
 0x13a   : > { %v2656_v46 = vsel %vm1454_vm0, %v1351_v12, -inf  ;;  %v2070_v58 = vpop.f32.mrb[28].mxu0  ;;  %v2134_v4 = vpop.f32.mrb[28].mxu1  ;;  %v2670_v12 = vsel %vm1454_vm0, %v1409_v5, -inf  ;;  %3160 = vst [vmem:[#allocation19_spill] sm:$0xff] %v2676_v25  ;;  %v1176_v5 = vadd.f32 %v2130_v13, %v2407_v24 }
 0x13b   : > { %v936_v20 = vadd.f32 %v2070_v58, %v2407_v24  ;;  %v927_v59 = vpop.f32.mrb[29].mxu0  ;;  %v1183_v19 = vpop.f32.mrb[29].mxu1  ;;  %3159 = vst [vmem:[#allocation18_spill] sm:$0xff] %v2670_v12  ;;  %v2694_v13 = vsel %vm1454_vm0, %v1410_v50, -inf  ;;  %v1192_v33 = vadd.f32 %v2134_v4, %v2407_v24 }
 0x13c   : > { %v928_v7 = vadd.f32 %v927_v59, %v2407_v24  ;;  %v2071_v10 = vpop.f32.mrb[30].mxu0  ;;  %v2135_v0 = vpop.f32.mrb[30].mxu1  ;;  %v1413_v59 = vmax.f32 %v1163_v28, 0.0  ;;  %3162 = vst [vmem:[#allocation21_spill] sm:$0xff] %v2694_v13  ;;  %v1171_v28 = vadd.f32 %v1170_v1, %v2407_v24 }
 0x13d   : > { %v1356_v58 = vmax.f32 %v936_v20, 0.0  ;;  %v939_v52 = vadd.f32 %v2071_v10, %v2407_v24  ;;  %v930_v47 = vpop.f32.mrb[31].mxu0  ;;  %v1186_v29 = vpop.f32.mrb[31].mxu1  ;;  %v1411_v20 = vmax.f32 %v1155_v8, 0.0 }
 0x13e   : > { %v1354_v39 = vmax.f32 %v928_v7, 0.0  ;;  %v931_v22 = vadd.f32 %v930_v47, %v2407_v24  ;;  %v1179_v47 = vadd.f32 %v2131_v31, %v2407_v24  ;;  %v2713_v1 = vsel %vm1454_vm0, %v1413_v59, -inf }
 0x13f   : > { %v2686_v6 = vsel %vm1454_vm0, %v1356_v58, -inf  ;;  %v1357_v36 = vmax.f32 %v939_v52, 0.0  ;;  %v1416_v52 = vmax.f32 %v1176_v5, 0.0  ;;  %3163 = vst [vmem:[#allocation22_spill] sm:$0xff] %v2713_v1  ;;  %v2716_v8 = vsel %vm1454_vm0, %v1411_v20, -inf }
 0x140   : > { %v2691_v30 = vsel %vm1454_vm0, %v1354_v39, -inf  ;;  %v1355_v48 = vmax.f32 %v931_v22, 0.0  ;;  %v1414_v22 = vmax.f32 %v1168_v35, 0.0  ;;  %3164 = vst [vmem:[#allocation23_spill] sm:$0xff] %v2716_v8  ;;  %v1417_v25 = vmax.f32 %v1179_v47, 0.0 }
 0x141   : > { %v2700_v7 = vsel %vm1454_vm0, %v1357_v36, -inf  ;;  %v1195_v31 = vadd.f32 %v2135_v0, %v2407_v24  ;;  %v2723_v59 = vsel %vm1454_vm0, %v1416_v52, -inf  ;;  %v1415_v1 = vmax.f32 %v1171_v28, 0.0 }
 0x142   : > { %v2706_v39 = vsel %vm1454_vm0, %v1355_v48, -inf  ;;  %v2074_v58 = vpop.f32.mrb[32].mxu0  ;;  %v2138_v50 = vpop.f32.mrb[32].mxu1  ;;  %v1184_v48 = vadd.f32 %v1183_v19, %v2407_v24  ;;  %3165 = vst [vmem:[#allocation24_spill] sm:$0xff] %v2723_v59  ;;  %v2727_v19 = vsel %vm1454_vm0, %v1414_v22, -inf  ;;  %v3167_v28 = vmax.f32 %v2428_v57, %v2536_v27 }
 0x143   : > { %v952_v36 = vadd.f32 %v2074_v58, %v2407_v24  ;;  %v943_v10 = vpop.f32.mrb[33].mxu0  ;;  %v1199_v5 = vpop.f32.mrb[33].mxu1  ;;  %v3169_v57 = vmax.f32 %v2460_v15, %v2556_v37 }
 0x144   : > { %v944_v13 = vadd.f32 %v943_v10, %v2407_v24  ;;  %v2075_v35 = vpop.f32.mrb[34].mxu0  ;;  %v2139_v45 = vpop.f32.mrb[34].mxu1  ;;  %v1420_v10 = vmax.f32 %v1192_v33, 0.0  ;;  %v1418_v0 = vmax.f32 %v1184_v48, 0.0  ;;  %v2746_v48 = vsel %vm1454_vm0, %v1415_v1, -inf }
 0x145   : > { %v1360_v4 = vmax.f32 %v952_v36, 0.0  ;;  %v955_v58 = vadd.f32 %v2075_v35, %v2407_v24  ;;  %v946_v12 = vpop.f32.mrb[35].mxu0  ;;  %v1202_v56 = vpop.f32.mrb[35].mxu1  ;;  %v3166_v36 = vmax.f32 %v2421_v53, %v2529_v18  ;;  %v1187_v53 = vadd.f32 %v1186_v29, %v2407_v24 }
 0x146   : > { %v1358_v20 = vmax.f32 %v944_v13, 0.0  ;;  %v947_v8 = vadd.f32 %v946_v12, %v2407_v24  ;;  %v2737_v13 = vsel %vm1454_vm0, %v1417_v25, -inf  ;;  %v1421_v12 = vmax.f32 %v1195_v31, 0.0 }
 0x147   : > { %v1488_v47 = vsel %vm1454_vm0, %v1360_v4, -inf  ;;  %v1361_v21 = vmax.f32 %v955_v58, 0.0  ;;  %v3168_v18 = vmax.f32 %v2442_v3, %v2546_v32  ;;  %v1200_v1 = vadd.f32 %v1199_v5, %v2407_v24 }
 0x148   : > { %v2733_v35 = vmax.f32 %v3166_v36, %v1488_v47  ;;  %v1458_v52 = vsel %vm1454_vm0, %v1358_v20, -inf  ;;  %v1359_v59 = vmax.f32 %v947_v8, 0.0  ;;  %v2764_v3 = vsel %vm1454_vm0, %v1420_v10, -inf }
 0x149   : > { %v2742_v33 = vmax.f32 %v3167_v28, %v1458_v52  ;;  %v1503_v22 = vsel %vm1454_vm0, %v1361_v21, -inf  ;;  %v1208_v21 = vadd.f32 %v2138_v50, %v2407_v24  ;;  %v2767_v32 = vsel %vm1454_vm0, %v1418_v0, -inf }
 0x14a   : > { %v2752_v8 = vmax.f32 %v3168_v18, %v1503_v22  ;;  %v1473_v25 = vsel %vm1454_vm0, %v1359_v59, -inf  ;;  %v2078_v31 = vpop.f32.mrb[36].mxu0  ;;  %v2142_v4 = vpop.f32.mrb[36].mxu1  ;;  %v1211_v59 = vadd.f32 %v2139_v45, %v2407_v24  ;;  %v2772_v50 = vsel %vm1454_vm0, %v1421_v12, -inf }
 0x14b   : > { %v2758_v27 = vmax.f32 %v3169_v57, %v1473_v25  ;;  %v968_v29 = vadd.f32 %v2078_v31, %v2407_v24  ;;  %v959_v58 = vpop.f32.mrb[37].mxu0  ;;  %v1215_v20 = vpop.f32.mrb[37].mxu1  ;;  %3170 = vst [vmem:[#allocation25_spill] sm:$0xff] %v2772_v50  ;;  %v1203_v36 = vadd.f32 %v1202_v56, %v2407_v24  ;;  %v1419_v22 = vmax.f32 %v1187_v53, 0.0 }
 0x14c   : > { %v960_v15 = vadd.f32 %v959_v58, %v2407_v24  ;;  %v2079_v37 = vpop.f32.mrb[38].mxu0  ;;  %v2143_v47 = vpop.f32.mrb[38].mxu1  ;;  %v1224_v45 = vadd.f32 %v2142_v4, %v2407_v24  ;;  %v1424_v25 = vmax.f32 %v1208_v21, 0.0  ;;  %v1422_v31 = vmax.f32 %v1200_v1, 0.0 }
 0x14d   : > { %v1364_v5 = vmax.f32 %v968_v29, 0.0  ;;  %v971_v52 = vadd.f32 %v2079_v37, %v2407_v24  ;;  %v962_v28 = vpop.f32.mrb[39].mxu0  ;;  %v1218_v10 = vpop.f32.mrb[39].mxu1  ;;  %v1425_v12 = vmax.f32 %v1211_v59, 0.0  ;;  %v3171_v29 = vmax.f32 %v2472_v26, %v2585_v49 }
 0x14e   : > { %v1362_v18 = vmax.f32 %v960_v15, 0.0  ;;  %v963_v0 = vadd.f32 %v962_v28, %v2407_v24  ;;  %v1423_v53 = vmax.f32 %v1203_v36, 0.0  ;;  %v3172_v15 = vmax.f32 %v2480_v34, %v2593_v63 }
 0x14f   : > { %v1548_v57 = vsel %vm1454_vm0, %v1364_v5, -inf  ;;  %v1365_v58 = vmax.f32 %v971_v52, 0.0  ;;  %v1216_v21 = vadd.f32 %v1215_v20, %v2407_v24  ;;  %v2793_v1 = vsel %vm1454_vm0, %v1419_v22, -inf }
 0x150   : > { %v2782_v56 = vmax.f32 %v3171_v29, %v1548_v57  ;;  %v1518_v37 = vsel %vm1454_vm0, %v1362_v18, -inf  ;;  %v1363_v50 = vmax.f32 %v963_v0, 0.0  ;;  %v3173_v26 = vmax.f32 %v2487_v38, %v2601_v11 }
 0x151   : > { %v2788_v28 = vmax.f32 %v3172_v15, %v1518_v37  ;;  %v1563_v4 = vsel %vm1454_vm0, %v1365_v58, -inf  ;;  %v1428_v5 = vmax.f32 %v1224_v45, 0.0  ;;  %v3174_v34 = vmax.f32 %v2496_v44, %v2609_v14 }
 0x152   : > { %v2798_v49 = vmax.f32 %v3173_v26, %v1563_v4  ;;  %v1533_v59 = vsel %vm1454_vm0, %v1363_v50, -inf  ;;  %v2082_v36 = vpop.f32.mrb[40].mxu0  ;;  %v2146_v52 = vpop.f32.mrb[40].mxu1  ;;  %v1227_v20 = vadd.f32 %v2143_v47, %v2407_v24  ;;  %v1219_v18 = vadd.f32 %v1218_v10, %v2407_v24 }
 0x153   : > { %v2804_v63 = vmax.f32 %v3174_v34, %v1533_v59  ;;  %v984_v22 = vadd.f32 %v2082_v36, %v2407_v24  ;;  %v975_v0 = vpop.f32.mrb[41].mxu0  ;;  %v1231_v38 = vpop.f32.mrb[41].mxu1  ;;  %v2810_v11 = vsel %vm1454_vm0, %v1424_v25, -inf  ;;  %v2813_v50 = vsel %vm1454_vm0, %v1422_v31, -inf }
 0x154   : > { %v2816_v45 = vsel %vm1454_vm0, %v1425_v12, -inf  ;;  %v976_v44 = vadd.f32 %v975_v0, %v2407_v24  ;;  %v2083_v14 = vpop.f32.mrb[42].mxu0  ;;  %v2147_v57 = vpop.f32.mrb[42].mxu1  ;;  %v2820_v47 = vsel %vm1454_vm0, %v1423_v53, -inf  ;;  %v1426_v58 = vmax.f32 %v1216_v21, 0.0 }
 0x155   : > { %v1368_v10 = vmax.f32 %v984_v22, 0.0  ;;  %v987_v29 = vadd.f32 %v2083_v14, %v2407_v24  ;;  %v978_v37 = vpop.f32.mrb[43].mxu0  ;;  %v1234_v25 = vpop.f32.mrb[43].mxu1  ;;  %v2824_v15 = vsel %vm1454_vm0, %v1428_v5, -inf  ;;  %v1240_v4 = vadd.f32 %v2146_v52, %v2407_v24 }
 0x156   : > { %v1366_v31 = vmax.f32 %v976_v44, 0.0  ;;  %v979_v12 = vadd.f32 %v978_v37, %v2407_v24  ;;  %v1429_v26 = vmax.f32 %v1227_v20, 0.0  ;;  %v1427_v36 = vmax.f32 %v1219_v18, 0.0 }
 0x157   : > { %v1608_v59 = vsel %vm1454_vm0, %v1368_v10, -inf  ;;  %v1369_v53 = vmax.f32 %v987_v29, 0.0  ;;  %v3175_v21 = vmax.f32 %v2505_v51, %v2636_v41  ;;  %v1232_v5 = vadd.f32 %v1231_v38, %v2407_v24 }
 0x158   : > { %v1578_v22 = vsel %vm1454_vm0, %v1366_v31, -inf  ;;  %v1367_v0 = vmax.f32 %v979_v12, 0.0  ;;  %v2837_v44 = vsel %vm1454_vm0, %v1426_v58, -inf  ;;  %v3176_v52 = vmax.f32 %v2514_v60, %v2641_v43 }
 0x159   : > { %v2832_v34 = vmax.f32 %v3175_v21, %v1608_v59  ;;  %v1623_v18 = vsel %vm1454_vm0, %v1369_v53, -inf  ;;  %v1243_v14 = vadd.f32 %v2147_v57, %v2407_v24  ;;  %v3177_v51 = vmax.f32 %v2524_v16, %v2648_v42 }
 0x15a   : > { %v2842_v20 = vmax.f32 %v3176_v52, %v1578_v22  ;;  %v1593_v10 = vsel %vm1454_vm0, %v1367_v0, -inf  ;;  %v1432_v38 = vmax.f32 %v1240_v4, 0.0  ;;  %v2086_v29 = vpop.f32.mrb[44].mxu0  ;;  %v1235_v58 = vadd.f32 %v1234_v25, %v2407_v24  ;;  %v2150_v37 = vpop.f32.mrb[44].mxu1 }
 0x15b   : > { %v2849_v41 = vmax.f32 %v3177_v51, %v1623_v18  ;;  %v2854_v60 = vsel %vm1454_vm0, %v1429_v26, -inf  ;;  %v3178_v43 = vmax.f32 %v2549_v2, %v2656_v46  ;;  %v1000_v57 = vadd.f32 %v2086_v29, %v2407_v24  ;;  %v991_v16 = vpop.f32.mrb[45].mxu0  ;;  %v1247_v12 = vpop.f32.mrb[45].mxu1 }
 0x15c   : > { %v1256_v42 = vadd.f32 %v2150_v37, %v2407_v24  ;;  %v2864_v4 = vsel %vm1454_vm0, %v1427_v36, -inf  ;;  %v1430_v59 = vmax.f32 %v1232_v5, 0.0  ;;  %v992_v25 = vadd.f32 %v991_v16, %v2407_v24  ;;  %v2087_v53 = vpop.f32.mrb[46].mxu0  ;;  %v2151_v21 = vpop.f32.mrb[46].mxu1 }
 0x15d   : > { %v2859_v31 = vmax.f32 %v3178_v43, %v1593_v10  ;;  %v1248_v26 = vadd.f32 %v1247_v12, %v2407_v24  ;;  %v1433_v22 = vmax.f32 %v1243_v14, 0.0  ;;  %v1372_v2 = vmax.f32 %v1000_v57, 0.0  ;;  %v994_v0 = vpop.f32.mrb[47].mxu0  ;;  %v1250_v18 = vpop.f32.mrb[47].mxu1 }
 0x15e   : > { %v1003_v46 = vadd.f32 %v2087_v53, %v2407_v24  ;;  %v1259_v52 = vadd.f32 %v2151_v21, %v2407_v24  ;;  %v2871_v51 = vsel %vm1454_vm0, %v1432_v38, -inf  ;;  %v1431_v36 = vmax.f32 %v1235_v58, 0.0 }
 0x15f   : > { %v1370_v10 = vmax.f32 %v992_v25, 0.0  ;;  %v995_v5 = vadd.f32 %v994_v0, %v2407_v24  ;;  %v1668_v29 = vsel %vm1454_vm0, %v1372_v2, -inf  ;;  %v1436_v43 = vmax.f32 %v1256_v42, 0.0 }
 0x160   : > { %v1373_v37 = vmax.f32 %v1003_v46, 0.0  ;;  %v1434_v16 = vmax.f32 %v1248_v26, 0.0  ;;  %v3179_v14 = vmax.f32 %v2582_v40, %v2686_v6  ;;  %v1437_v21 = vmax.f32 %v1259_v52, 0.0 }
 0x161   : > { %v1638_v12 = vsel %vm1454_vm0, %v1370_v10, -inf  ;;  %v1371_v53 = vmax.f32 %v995_v5, 0.0  ;;  %v2882_v38 = vsel %vm1454_vm0, %v1430_v59, -inf  ;;  %v2885_v58 = vsel %vm1454_vm0, %v1433_v22, -inf }
 0x162   : > { %v2878_v57 = vmax.f32 %v3179_v14, %v1668_v29  ;;  %v3180_v25 = vmax.f32 %v2596_v62, %v2691_v30  ;;  %v1683_v26 = vsel %vm1454_vm0, %v1373_v37, -inf  ;;  %v2894_v40 = vsel %vm1454_vm0, %v1431_v36, -inf  ;;  %v2090_v46 = vpop.f32.mrb[48].mxu0  ;;  %v2154_v0 = vpop.f32.mrb[48].mxu1 }
 0x163   : > { %v3181_v6 = vmax.f32 %v2619_v17, %v2700_v7  ;;  %v1653_v59 = vsel %vm1454_vm0, %v1371_v53, -inf  ;;  %v2903_v22 = vadd.f32 %v1250_v18, %v2407_v24  ;;  %v3182_v30 = vmax.f32 %v2631_v23, %v2706_v39  ;;  %v1007_v17 = vpop.f32.mrb[49].mxu0  ;;  %v1263_v10 = vpop.f32.mrb[49].mxu1 }
 0x164   : > { %v2890_v42 = vmax.f32 %v3180_v25, %v1638_v12  ;;  %v2911_v52 = vsel %vm1454_vm0, %v1436_v43, -inf  ;;  %v1016_v36 = vadd.f32 %v2090_v46, %v2407_v24  ;;  %v1272_v7 = vadd.f32 %v2154_v0, %v2407_v24  ;;  %v2091_v23 = vpop.f32.mrb[50].mxu0  ;;  %v2155_v37 = vpop.f32.mrb[50].mxu1 }
 0x165   : > { %v2899_v2 = vmax.f32 %v3181_v6, %v1683_v26  ;;  %v2908_v62 = vmax.f32 %v3182_v30, %v1653_v59  ;;  %v2916_v5 = vsel %vm1454_vm0, %v1434_v16, -inf  ;;  %v2919_v18 = vsel %vm1454_vm0, %v1437_v21, -inf  ;;  %v1010_v12 = vpop.f32.mrb[51].mxu0  ;;  %v1266_v26 = vpop.f32.mrb[51].mxu1 }
 0x166   : > { %3183 = vst [vmem:[#allocation26_spill] sm:$0xff] %v2919_v18  ;;  %v1008_v29 = vadd.f32 %v1007_v17, %v2407_v24  ;;  %v1264_v39 = vadd.f32 %v1263_v10, %v2407_v24  ;;  %v1376_v43 = vmax.f32 %v1016_v36, 0.0  ;;  %v1019_v14 = vadd.f32 %v2091_v23, %v2407_v24 }
 0x167   : > { %v1440_v53 = vmax.f32 %v1272_v7, 0.0  ;;  %v1275_v25 = vadd.f32 %v2155_v37, %v2407_v24  ;;  %v1011_v16 = vadd.f32 %v1010_v12, %v2407_v24  ;;  %v1267_v21 = vadd.f32 %v1266_v26, %v2407_v24 }
 0x168   : > { %v1374_v6 = vmax.f32 %v1008_v29, 0.0  ;;  %v1438_v59 = vmax.f32 %v1264_v39, 0.0  ;;  %v1490_v46 = vsel %vm1454_vm0, %v1376_v43, -inf  ;;  %v1377_v30 = vmax.f32 %v1019_v14, 0.0 }
 0x169   : > { %v1441_v17 = vmax.f32 %v1275_v25, 0.0  ;;  %v1491_v36 = vmax.f32 %v2733_v35, %v1490_v46  ;;  %v1375_v7 = vmax.f32 %v1011_v16, 0.0  ;;  %v1498_v23 = vsel %vm1454_vm0, %v1440_v53, -inf }
 0x16a   : > { %v1460_v10 = vsel %vm1454_vm0, %v1374_v6, -inf  ;;  %v1505_v37 = vsel %vm1454_vm0, %v1377_v30, -inf  ;;  %v1468_v39 = vsel %vm1454_vm0, %v1438_v59, -inf  ;;  %v1439_v12 = vmax.f32 %v1267_v21, 0.0  ;;  %v2094_v25 = vpop.f32.mrb[52].mxu0  ;;  %v2158_v6 = vpop.f32.mrb[52].mxu1 }
 0x16b   : > { %v1461_v29 = vmax.f32 %v2742_v33, %v1460_v10  ;;  %v1493_v43 = vmax.f32 %v1491_v36, %v2424_v54  ;;  %v1506_v26 = vmax.f32 %v2752_v8, %v1505_v37  ;;  %v1475_v14 = vsel %vm1454_vm0, %v1375_v7, -inf  ;;  %v1023_v59 = vpop.f32.mrb[53].mxu0  ;;  %v1279_v21 = vpop.f32.mrb[53].mxu1  ;;  %v3184_v7 = vld [vmem:[#allocation4_spill] sm:$0xff] }
 0x16c   : > { %v1513_v35 = vsel %vm1454_vm0, %v1441_v17, -inf  ;;  %v1476_v53 = vmax.f32 %v2758_v27, %v1475_v14  ;;  %v1032_v33 = vadd.f32 %v2094_v25, %v2407_v24  ;;  %v1483_v46 = vsel %vm1454_vm0, %v1439_v12, -inf  ;;  %v2095_v36 = vpop.f32.mrb[54].mxu0  ;;  %v2159_v10 = vpop.f32.mrb[54].mxu1 }
 0x16d   : > { %v1463_v16 = vmax.f32 %v1461_v29, %v2433_v61  ;;  %v1508_v54 = vmax.f32 %v1506_v26, %v2451_v9  ;;  %v1495_v8 = vmax.f32 %v1493_v43, %v2659_v55  ;;  %v1024_v30 = vadd.f32 %v1023_v59, %v2407_v24  ;;  %v3185_v29 = vld [vmem:[#allocation17_spill] sm:$0xff]  ;;  %v1026_v12 = vpop.f32.mrb[55].mxu0  ;;  %v2950_v25 = vpop.f32.mrb[55].mxu1  ;;  %v3186_v26 = vld [vmem:[#allocation18_spill] sm:$0xff] }
 0x16e   : > { %v1288_v17 = vadd.f32 %v2158_v6, %v2407_v24  ;;  %v1478_v61 = vmax.f32 %v1476_v53, %v3184_v7  ;;  %v1380_v37 = vmax.f32 %v1032_v33, 0.0  ;;  %v1035_v14 = vadd.f32 %v2095_v36, %v2407_v24  ;;  %v3187_v53 = vld [vmem:[#allocation19_spill] sm:$0xff] }
 0x16f   : > { %v1465_v27 = vmax.f32 %v1463_v16, %v3185_v29  ;;  %v1497_v9 = vmax.f32 %v1495_v8, %v2810_v11  ;;  %v1510_v55 = vmax.f32 %v1508_v54, %v3186_v26  ;;  %v1378_v43 = vmax.f32 %v1024_v30, 0.0  ;;  %v3190_v26 = vld [vmem:[#allocation7_spill] sm:$0xff] }
 0x170   : > { %v1027_v59 = vadd.f32 %v1026_v12, %v2407_v24  ;;  %v1550_v0 = vsel %vm1454_vm0, %v1380_v37, -inf  ;;  %v1480_v7 = vmax.f32 %v1478_v61, %v3187_v53  ;;  %v1381_v16 = vmax.f32 %v1035_v14, 0.0  ;;  %v3188_v37 = vld [vmem:[#allocation5_spill] sm:$0xff] }
 0x171   : > { %v1467_v6 = vmax.f32 %v1465_v27, %v2813_v50  ;;  %v1499_v33 = vmax.f32 %v1497_v9, %v1498_v23  ;;  %v1512_v36 = vmax.f32 %v1510_v55, %v2816_v45  ;;  %v1551_v29 = vmax.f32 %v2782_v56, %v1550_v0 }
 0x172   : > { %v1520_v18 = vsel %vm1454_vm0, %v1378_v43, -inf  ;;  %v1482_v54 = vmax.f32 %v1480_v7, %v2820_v47  ;;  %v1565_v30 = vsel %vm1454_vm0, %v1381_v16, -inf  ;;  %v2098_v14 = vpop.f32.mrb[56].mxu0  ;;  %v2967_v45 = vpop.f32.mrb[56].mxu1  ;;  %v1379_v47 = vmax.f32 %v1027_v59, 0.0  ;;  %v3191_v43 = vld [vmem:[#allocation20_spill] sm:$0xff] }
 0x173   : > { %v1469_v11 = vmax.f32 %v1467_v6, %v1468_v39  ;;  %v1521_v8 = vmax.f32 %v2788_v28, %v1520_v18  ;;  %v1704_v50 = vsel %vm1454_vm0, %v1499_v33, 0.0  ;;  %v1514_v27 = vmax.f32 %v1512_v36, %v1513_v35  ;;  %v3189_v39 = vld [vmem:[#allocation6_spill] sm:$0xff]  ;;  %v1039_v9 = vpop.f32.mrb[57].mxu0  ;;  %v2971_v28 = vpop.f32.mrb[57].mxu1 }
 0x174   : > { %v1553_v61 = vmax.f32 %v1551_v29, %v3188_v37  ;;  %v1566_v23 = vmax.f32 %v2798_v49, %v1565_v30  ;;  %v1484_v0 = vmax.f32 %v1482_v54, %v1483_v46  ;;  %v1444_v55 = vmax.f32 %v1288_v17, 0.0  ;;  %v2099_v49 = vpop.f32.mrb[58].mxu0  ;;  %v2976_v53 = vpop.f32.mrb[58].mxu1 }
 0x175   : > { %v1695_v56 = vsel %vm1454_vm0, %v1469_v11, 0.0  ;;  %v1523_v12 = vmax.f32 %v1521_v8, %v3189_v39  ;;  %v1705_v18 = vsel %vm1454_vm0, %v1514_v27, 0.0  ;;  %v1535_v46 = vsel %vm1454_vm0, %v1379_v47, -inf  ;;  %v1042_v33 = vpop.f32.mrb[59].mxu0  ;;  %v2981_v36 = vpop.f32.mrb[59].mxu1  ;;  %v3192_v27 = vld [vmem:[#allocation21_spill] sm:$0xff] }
 0x176   : > { %v1568_v35 = vmax.f32 %v1566_v23, %v3190_v26  ;;  %v1555_v6 = vmax.f32 %v1553_v61, %v3191_v43  ;;  %v1706_v7 = vadd.f32 %v1705_v18, %v1704_v50  ;;  %v1696_v16 = vsel %vm1454_vm0, %v1484_v0, 0.0  ;;  %v3193_v23 = vld [vmem:[#allocation8_spill] sm:$0xff]  ;;  %v3194_v39 = vld [vmem:[#allocation22_spill] sm:$0xff] }
 0x177   : > { %v1280_v59 = vadd.f32 %v1279_v21, %v2407_v24  ;;  %v1697_v29 = vadd.f32 %v1696_v16, %v1695_v56  ;;  %v1536_v11 = vmax.f32 %v2804_v63, %v1535_v46  ;;  %v1558_v54 = vsel %vm1454_vm0, %v1444_v55, -inf }
 0x178   : > { %v1557_v17 = vmax.f32 %v1555_v6, %v2824_v15  ;;  %v1707_v8 = vrot.slane %v1706_v7, 4  ;;  %v1525_v50 = vmax.f32 %v1523_v12, %v3192_v27  ;;  %v1291_v37 = vadd.f32 %v2159_v10, %v2407_v24 }
 0x179   : > { %v1442_v30 = vmax.f32 %v1280_v59, 0.0  ;;  %v1698_v61 = vrot.slane %v1697_v29, 4  ;;  %v1538_v0 = vmax.f32 %v1536_v11, %v3193_v23  ;;  %v1570_v47 = vmax.f32 %v1568_v35, %v3194_v39 }
 0x17a   : > { %v1559_v21 = vmax.f32 %v1557_v17, %v1558_v54  ;;  %v1708_v18 = vadd.f32 %v1707_v8, %v1706_v7  ;;  %v1527_v56 = vmax.f32 %v1525_v50, %v2837_v44  ;;  %v1445_v15 = vmax.f32 %v1291_v37, 0.0  ;;  %v2995_v10 = vpop.f32.mrb[60].mxu0  ;;  %v2997_v6 = vpop.f32.mrb[60].mxu1  ;;  %v3195_v17 = vld [vmem:[#allocation23_spill] sm:$0xff] }
 0x17b   : > { %v1528_v63 = vsel %vm1454_vm0, %v1442_v30, -inf  ;;  %v1699_v26 = vadd.f32 %v1698_v61, %v1697_v29  ;;  %v1572_v43 = vmax.f32 %v1570_v47, %v2854_v60  ;;  %v1048_v12 = vadd.f32 %v2098_v14, %v2407_v24  ;;  %v3002_v7 = vpop.f32.mrb[61].mxu0  ;;  %v3004_v59 = vpop.f32.mrb[61].mxu1 }
 0x17c   : > { %v1722_v55 = vsel %vm1454_vm0, %v1559_v21, 0.0  ;;  %v1709_v16 = vrot.slane %v1708_v18, 2  ;;  %v1529_v46 = vmax.f32 %v1527_v56, %v1528_v63  ;;  %v1573_v35 = vsel %vm1454_vm0, %v1445_v15, -inf  ;;  %v3007_v54 = vpop.f32.mrb[62].mxu0  ;;  %v3009_v8 = vpop.f32.mrb[62].mxu1 }
 0x17d   : > { %v1283_v44 = vadd.f32 %v2950_v25, %v2407_v24  ;;  %v1700_v29 = vrot.slane %v1699_v26, 2  ;;  %v1574_v11 = vmax.f32 %v1572_v43, %v1573_v35  ;;  %v1384_v60 = vmax.f32 %v1048_v12, 0.0  ;;  %v3013_v25 = vpop.f32.mrb[63].mxu0  ;;  %v3015_v61 = vpop.f32.mrb[63].mxu1 }
 0x17e   : > { %v1540_v14 = vmax.f32 %v1538_v0, %v3195_v17  ;;  %v1710_v30 = vadd.f32 %v1709_v16, %v1708_v18  ;;  %v1713_v27 = vsel %vm1454_vm0, %v1529_v46, 0.0  ;;  %v1040_v37 = vadd.f32 %v1039_v9, %v2407_v24 }
 0x17f   : > { %v1443_v50 = vmax.f32 %v1283_v44, 0.0  ;;  %v1701_v23 = vadd.f32 %v1700_v29, %v1699_v26  ;;  %v1723_v21 = vsel %vm1454_vm0, %v1574_v11, 0.0  ;;  %v1610_v39 = vsel %vm1454_vm0, %v1384_v60, -inf  ;;  %v3196_v26 = vld [vmem:[#allocation9_spill] sm:$0xff] }
 0x180   : > { %v1542_v0 = vmax.f32 %v1540_v14, %v2864_v4  ;;  %v1711_v47 = vrot.slane %v1710_v30, 1  ;;  %v1724_v56 = vadd.f32 %v1723_v21, %v1722_v55  ;;  %v1611_v18 = vmax.f32 %v2832_v34, %v1610_v39 }
 0x181   : > { %v1543_v63 = vsel %vm1454_vm0, %v1443_v50, -inf  ;;  %v1702_v15 = vrot.slane %v1701_v23, 1  ;;  %v1382_v9 = vmax.f32 %v1040_v37, 0.0  ;;  %v1051_v12 = vadd.f32 %v2099_v49, %v2407_v24 }
 0x182   : > { %v1544_v43 = vmax.f32 %v1542_v0, %v1543_v63  ;;  %v1712_v16 = vadd.f32 %v1711_v47, %v1710_v30  ;;  %v1725_v46 = vrot.slane %v1724_v56, 4  ;;  %v1613_v35 = vmax.f32 %v1611_v18, %v3196_v26  ;;  %v3198_v30 = vld [vmem:[#allocation3_spill] sm:$0xff]  ;;  %v3199_v0 = vld [vmem:[#allocation10_spill] sm:$0xff]  ;;  %v3200_v18 = vld [vmem:[#allocation24_spill] sm:$0xff] }
 0x183   : > { %v1043_v44 = vadd.f32 %v1042_v33, %v2407_v24  ;;  %v1703_v29 = vadd.f32 %v1702_v15, %v1701_v23  ;;  %v1580_v55 = vsel %vm1454_vm0, %v1382_v9, -inf  ;;  %v1385_v11 = vmax.f32 %v1051_v12, 0.0  ;;  %v3201_v12 = vld [vmem:[#allocation11_spill] sm:$0xff] }
 0x184   : > { %v1714_v4 = vsel %vm1454_vm0, %v1544_v43, 0.0  ;;  %v3197_v34 = vmax.f32 %v2903_v22, 0.0  ;;  %v1726_v17 = vadd.f32 %v1725_v46, %v1724_v56  ;;  %v1581_v49 = vmax.f32 %v2842_v20, %v1580_v55 }
 0x185   : > { %v1715_v14 = vadd.f32 %v1714_v4, %v1713_v27  ;;  %v3034_v50 = vmul.f32 %v3198_v30, %v1712_v16  ;;  %v1625_v33 = vsel %vm1454_vm0, %v1385_v11, -inf  ;;  %v1383_v37 = vmax.f32 %v1043_v44, 0.0  ;;  %v3202_v4 = vld [vmem:[#allocation12_spill] sm:$0xff] }
 0x186   : > { %v3030_v60 = vsel %vm1454_vm0, %v3197_v34, -inf  ;;  %v1304_v23 = vadd.f32 %v2967_v45, %v2407_v24  ;;  %v3040_v21 = vmul.f32 %v3198_v30, %v1703_v29  ;;  %v1727_v22 = vrot.slane %v1726_v17, 2 }
 0x187   : > { %v1716_v39 = vrot.slane %v1715_v14, 4  ;;  %v1583_v47 = vmax.f32 %v1581_v49, %v3199_v0  ;;  %v1626_v27 = vmax.f32 %v2849_v41, %v1625_v33  ;;  %v1595_v20 = vsel %vm1454_vm0, %v1383_v37, -inf }
 0x188   : > { %v1448_v56 = vmax.f32 %v1304_v23, 0.0  ;;  %v1615_v63 = vmax.f32 %v1613_v35, %v3200_v18  ;;  %v1728_v15 = vadd.f32 %v1727_v22, %v1726_v17  ;;  %v1596_v9 = vmax.f32 %v2859_v31, %v1595_v20 }
 0x189   : > { %v1717_v43 = vadd.f32 %v1716_v39, %v1715_v14  ;;  %v1296_v45 = vadd.f32 %v2971_v28, %v2407_v24  ;;  %v1628_v16 = vmax.f32 %v1626_v27, %v3201_v12  ;;  %v1585_v41 = vmax.f32 %v1583_v47, %v2727_v19 }
 0x18a   : > { %v1617_v46 = vmax.f32 %v1615_v63, %v2871_v51  ;;  %v1618_v26 = vsel %vm1454_vm0, %v1448_v56, -inf  ;;  %v1729_v44 = vrot.slane %v1728_v15, 1  ;;  %v1598_v55 = vmax.f32 %v1596_v9, %v3202_v4 }
 0x18b   : > { %v1718_v29 = vrot.slane %v1717_v43, 2  ;;  %v1446_v35 = vmax.f32 %v1296_v45, 0.0  ;;  %v1587_v34 = vmax.f32 %v1585_v41, %v2882_v38  ;;  %v1307_v31 = vadd.f32 %v2976_v53, %v2407_v24  ;;  %v3203_v45 = vld [vmem:[#allocation13_spill] sm:$0xff] }
 0x18c   : > { %v1619_v11 = vmax.f32 %v1617_v46, %v1618_v26  ;;  %v1630_v28 = vmax.f32 %v1628_v16, %v2737_v13  ;;  %v1787_v17 = vrot.slane %v3034_v50, 7  ;;  %v1064_v19 = vadd.f32 %v2995_v10, %v2407_v24 }
 0x18d   : > { %v1719_v51 = vadd.f32 %v1718_v29, %v1717_v43  ;;  %v1588_v14 = vsel %vm1454_vm0, %v1446_v35, -inf  ;;  %v3062_v49 = vadd.f32 %v1729_v44, %v1728_v15  ;;  %v1449_v37 = vmax.f32 %v1307_v31, 0.0  ;;  %v3204_v35 = vld [vmem:[#allocation14_spill] sm:$0xff] }
 0x18e   : > { %v1589_v33 = vmax.f32 %v1587_v34, %v1588_v14  ;;  %v1632_v23 = vmax.f32 %v1630_v28, %v2885_v58  ;;  %v1388_v22 = vmax.f32 %v1064_v19, 0.0  ;;  %v1299_v53 = vadd.f32 %v2981_v36, %v2407_v24  ;;  %v3205_v28 = vld [vmem:[#allocation15_spill] sm:$0xff] }
 0x18f   : > { %v1720_v38 = vrot.slane %v1719_v51, 1  ;;  %v1600_v13 = vmax.f32 %v1598_v55, %v2746_v48  ;;  %v1740_v39 = vsel %vm1454_vm0, %v1619_v11, 0.0  ;;  %v1633_v0 = vsel %vm1454_vm0, %v1449_v37, -inf }
 0x190   : > { %v1056_v10 = vadd.f32 %v3002_v7, %v2407_v24  ;;  %v1067_v47 = vadd.f32 %v3007_v54, %v2407_v24  ;;  %v1634_v20 = vmax.f32 %v1632_v23, %v1633_v0  ;;  %v1670_v58 = vsel %vm1454_vm0, %v1388_v22, -inf }
 0x191   : > { %v1721_v27 = vadd.f32 %v1720_v38, %v1719_v51  ;;  %v1447_v56 = vmax.f32 %v1299_v53, 0.0  ;;  %v1671_v18 = vmax.f32 %v2878_v57, %v1670_v58  ;;  %v1602_v36 = vmax.f32 %v1600_v13, %v2894_v40  ;;  %v3206_v38 = vld [vmem:[#allocation16_spill] sm:$0xff] }
 0x192   : > { %v1386_v48 = vmax.f32 %v1056_v10, 0.0  ;;  %v1389_v63 = vmax.f32 %v1067_v47, 0.0  ;;  %v1731_v15 = vsel %vm1454_vm0, %v1589_v33, 0.0  ;;  %v1741_v43 = vsel %vm1454_vm0, %v1634_v20, 0.0  ;;  %v3207_v47 = vld [vmem:[#allocation25_spill] sm:$0xff] }
 0x193   : > { %v1603_v7 = vsel %vm1454_vm0, %v1447_v56, -inf  ;;  %v1059_v54 = vadd.f32 %v3013_v25, %v2407_v24  ;;  %v1742_v9 = vadd.f32 %v1741_v43, %v1740_v39  ;;  %v1673_v12 = vmax.f32 %v1671_v18, %v3203_v45 }
 0x194   : > { %v1604_v16 = vmax.f32 %v1602_v36, %v1603_v7  ;;  %v1640_v46 = vsel %vm1454_vm0, %v1386_v48, -inf  ;;  %v1773_v57 = vmul.f32 %v3198_v30, %v1721_v27  ;;  %v1685_v26 = vsel %vm1454_vm0, %v1389_v63, -inf  ;;  %v3208_v36 = vld [vmem:[#allocation26_spill] sm:$0xff] }
 0x195   : > { %v1641_v40 = vmax.f32 %v2890_v42, %v1640_v46  ;;  %v1387_v41 = vmax.f32 %v1059_v54, 0.0  ;;  %v1743_v44 = vrot.slane %v1742_v9, 4  ;;  %v1686_v4 = vmax.f32 %v2899_v2, %v1685_v26 }
 0x196   : > { %v1732_v29 = vsel %vm1454_vm0, %v1604_v16, 0.0  ;;  %v1320_v25 = vadd.f32 %v2997_v6, %v2407_v24  ;;  %v1675_v42 = vmax.f32 %v1673_v12, %v2764_v3  ;;  %v1312_v6 = vadd.f32 %v3004_v59, %v2407_v24 }
 0x197   : > { %v1733_v55 = vadd.f32 %v1732_v29, %v1731_v15  ;;  %v1643_v11 = vmax.f32 %v1641_v40, %v3204_v35  ;;  %v1655_v34 = vsel %vm1454_vm0, %v1387_v41, -inf  ;;  %v1744_v31 = vadd.f32 %v1743_v44, %v1742_v9 }
 0x198   : > { %v1688_v51 = vmax.f32 %v1686_v4, %v3205_v28  ;;  %v1656_v14 = vmax.f32 %v2908_v62, %v1655_v34  ;;  %v1452_v19 = vmax.f32 %v1320_v25, 0.0  ;;  %v1677_v2 = vmax.f32 %v1675_v42, %v2911_v52 }
 0x199   : > { %v1734_v33 = vrot.slane %v1733_v55, 4  ;;  %v1645_v37 = vmax.f32 %v1643_v11, %v2767_v32  ;;  %v1745_v23 = vrot.slane %v1744_v31, 2  ;;  %v1323_v3 = vadd.f32 %v3009_v8, %v2407_v24 }
 0x19a   : > { %v1658_v22 = vmax.f32 %v1656_v14, %v3206_v38  ;;  %v1678_v53 = vsel %vm1454_vm0, %v1452_v19, -inf  ;;  %v1450_v62 = vmax.f32 %v1312_v6, 0.0  ;;  %v1690_v27 = vmax.f32 %v1688_v51, %v3207_v47 }
 0x19b   : > { %v1735_v13 = vadd.f32 %v1734_v33, %v1733_v55  ;;  %v1679_v39 = vmax.f32 %v1677_v2, %v1678_v53  ;;  %v1647_v0 = vmax.f32 %v1645_v37, %v2916_v5  ;;  %v1746_v10 = vadd.f32 %v1745_v23, %v1744_v31 }
 0x19c   : > { %v1453_v52 = vmax.f32 %v1323_v3, 0.0  ;;  %v1315_v32 = vadd.f32 %v3015_v61, %v2407_v24  ;;  %v1790_v59 = vrot.slane %v1773_v57, 6  ;;  %v1648_v58 = vsel %vm1454_vm0, %v1450_v62, -inf }
 0x19d   : > { %v1736_v20 = vrot.slane %v1735_v13, 2  ;;  %v1660_v56 = vmax.f32 %v1658_v22, %v2793_v1  ;;  %v1747_v18 = vrot.slane %v1746_v10, 1  ;;  %v1649_v8 = vmax.f32 %v1647_v0, %v1648_v58 }
 0x19e   : > { %v1692_v48 = vmax.f32 %v1690_v27, %v3208_v36  ;;  %v1693_v63 = vsel %vm1454_vm0, %v1453_v52, -inf  ;;  %v1451_v15 = vmax.f32 %v1315_v32, 0.0  ;;  %v1774_v7 = vmul.f32 %v3198_v30, %v3062_v49 }
 0x19f   : > { %v1737_v5 = vadd.f32 %v1736_v20, %v1735_v13  ;;  %v1662_v43 = vmax.f32 %v1660_v56, %v3030_v60  ;;  %v1748_v61 = vadd.f32 %v1747_v18, %v1746_v10  ;;  %v1789_v1 = vsel %vm1788_vm1, %v1787_v17, %v3040_v21 }
 0x1a0   : > { %v1694_v24 = vmax.f32 %v1692_v48, %v1693_v63  ;;  %v1663_v9 = vsel %vm1454_vm0, %v1451_v15, -inf  ;;  %v1792_v45 = vsel %vm1791_vm2, %v1790_v59, %v1789_v1  ;;  %v1793_v12 = vrot.slane %v1774_v7, 5 }
 0x1a1   : > { %v1738_v54 = vrot.slane %v1737_v5, 1  ;;  %v1758_v16 = vsel %vm1454_vm0, %v1679_v39, 0.0  ;;  %v1664_v46 = vmax.f32 %v1662_v43, %v1663_v9  ;;  %v1749_v26 = vsel %vm1454_vm0, %v1649_v8, 0.0 }
 0x1a2   : > { %v1759_v60 = vsel %vm1454_vm0, %v1694_v24, 0.0  ;;  %v1795_v40 = vsel %vm1794_vm3, %v1793_v12, %v1792_v45  ;;  %v1776_v21 = vmul.f32 %v3198_v30, %v1748_v61  ;;  %v1813_v13 = vstv %s1812_s15 }
 0x1a3   : > { %v1739_v49 = vadd.f32 %v1738_v54, %v1737_v5  ;;  %v1760_v57 = vadd.f32 %v1759_v60, %v1758_v16  ;;  %v1750_v50 = vsel %vm1454_vm0, %v1664_v46, 0.0 }
 0x1a4   : > { %v1751_v41 = vadd.f32 %v1750_v50, %v1749_v26  ;;  %v1799_v55 = vrot.slane %v1776_v21, 3 }
 0x1a5   : > { %v1761_v17 = vrot.slane %v1760_v57, 4  ;;  %v1775_v44 = vmul.f32 %v3198_v30, %v1739_v49 }
 0x1a6   : > { %v1752_v4 = vrot.slane %v1751_v41, 4 }
 0x1a7   : > { %v1762_v29 = vadd.f32 %v1761_v17, %v1760_v57  ;;  %v1796_v25 = vrot.slane %v1775_v44, 4 }
 0x1a8   : > { %v1753_v11 = vadd.f32 %v1752_v4, %v1751_v41 }
 0x1a9   : > { %v1763_v35 = vrot.slane %v1762_v29, 2  ;;  %v1798_v34 = vsel %vm1797_vm4, %v1796_v25, %v1795_v40 }
 0x1aa   : > { %v1801_v42 = vsel %vm1800_vm5, %v1799_v55, %v1798_v34  ;;  %v1754_v31 = vrot.slane %v1753_v11, 2 }
 0x1ab   : > { %v1764_v28 = vadd.f32 %v1763_v35, %v1762_v29 }
 0x1ac   : > { %v1755_v51 = vadd.f32 %v1754_v31, %v1753_v11 }
 0x1ad   : > { %v1765_v14 = vrot.slane %v1764_v28, 1 }
 0x1ae   : > { %v1756_v19 = vrot.slane %v1755_v51, 1 }
 0x1af   : > { %v1766_v33 = vadd.f32 %v1765_v14, %v1764_v28 }
 0x1b0   : > { %v1757_v2 = vadd.f32 %v1756_v19, %v1755_v51 }
 0x1b1   : > { %v1778_v6 = vmul.f32 %v3198_v30, %v1766_v33 }
 0x1b2   : > { %v1777_v37 = vmul.f32 %v3198_v30, %v1757_v2 }
 0x1b3   : > { %v1805_v38 = vrot.slane %v1778_v6, 1 }
 0x1b4   : > { %v1802_v23 = vrot.slane %v1777_v37, 2 }
 0x1b6   : > { %v1804_v22 = vsel %vm1803_vm6, %v1802_v23, %v1801_v42 }
 0x1b7   : > { %v1807_v53 = vsel %vm1806_vm7, %v1805_v38, %v1804_v22 }
 0x1b8   : > { %v1809_v3 = vsel %vm1454_vm0, %v1807_v53, 0.0 }
 0x1b9   : > { %1810 = vadd.xlane.f32.xlu0 %v1809_v3 }
 0x246   : > { %v1811_v39 = vpop.xlane.xlu0 %1810 }
 0x247   : > { %v1814_v30 = vadd.f32 %v1813_v13, %v1811_v39 }
 0x249   : > { %1816 = vst.msk [vmem:[%s198_s3] sm:$0xff] %vm1815_vm8, %v1814_v30 }
 0x24a PF: > { %s15_s17 = sadd.s32 1, %s2270_s17  }
 0x24b   : > { %p12_p5 = scmp.ge.s32.totalorder %s15_s17, 4  }
 0x24d   :  { %14 = sbr.rel (!%p12_p5) target bundleno = 2 (0x2), region = 66 }

</bundles_post_ra>
